<compile_context>
chip_gen: v7x
topology: tpu7x:2x2x1
jax: 0.10.0
libtpu: 0.0.40
codegen_flags: <defaults>
</compile_context>

<pallas_src>
import functools
import math

import jax
import jax.numpy as jnp
from jax.experimental import pallas as pl
from jax.experimental.pallas import tpu as pltpu

MLP_EXPANSION_FACTOR = 4
RMS_NORM_EPS = 1e-6


# --------------------------------------------------------------------------
# Small helpers
# --------------------------------------------------------------------------
def _vmem_limit_bytes():
    """Generation-aware VMEM budget: ~75% of physical, capped at 100 MiB."""
    cap = 128 * 1024 * 1024
    try:
        cap = int(pltpu.get_tpu_info().vmem_capacity_bytes)
    except Exception:
        pass
    return int(min(100 * 1024 * 1024, (cap * 3) // 4))


def _resident_spec(shape):
    """Constant-index (grid-invariant) operand: kept resident in VMEM.

    Single-buffered via pipeline_mode=pl.Buffered(1) when the running JAX
    supports it (falls back to the default spec otherwise).
    """
    zeros = (0,) * len(shape)
    idx = lambda *args, _z=zeros: _z
    try:
        return pl.BlockSpec(shape, idx, pipeline_mode=pl.Buffered(1))
    except Exception:
        return pl.BlockSpec(shape, idx)


def _choose_row_tile(n_rows, vmem_limit):
    """Row tile for the streaming (B*S, D) stages; ragged tail handled by grid."""
    desired = 512 if vmem_limit >= 96 * 1024 * 1024 else 256
    if n_rows <= desired:
        return n_rows          # single full-extent block, any row count is legal
    return desired             # multiple of 8; last block may be partial


# --------------------------------------------------------------------------
# Kernel 1: RMSNorm1 + fused Q/K/V projection over row tiles of (B*S, D).
# --------------------------------------------------------------------------
def _qkv_kernel(x_ref, g1_ref, wqkv_ref, bqkv_ref, q_ref, k_ref, v_ref,
                *, eps: float, scale: float):
    x = x_ref[...]                                        # (tm, D) f32
    ms = jnp.mean(x * x, axis=-1, keepdims=True)
    xn = (x * jax.lax.rsqrt(ms + eps) * g1_ref[...]).astype(jnp.bfloat16)

    qkv = jnp.dot(xn, wqkv_ref[...],
                  preferred_element_type=jnp.float32) + bqkv_ref[...]   # (tm, 3D)

    D = q_ref.shape[1]
    q_ref[...] = (qkv[:, :D] * scale).astype(jnp.bfloat16)   # fold 1/sqrt(hd) into Q
    k_ref[...] = qkv[:, D:2 * D].astype(jnp.bfloat16)
    v_ref[...] = qkv[:, 2 * D:].astype(jnp.bfloat16)


# --------------------------------------------------------------------------
# Kernel 2: attention for one batch; all heads processed per grid step.
# q/k/v/out stay in the (S, D) = (S, n_heads*head_dim) row layout so there are
# no HBM transposes and the output store is lane-dense (width D).
# --------------------------------------------------------------------------
def _attn_kernel(mask_ref, q_ref, k_ref, v_ref, o_ref, *, n_heads: int):
    S, D = q_ref.shape[1], q_ref.shape[2]
    hd = D // n_heads

    q = q_ref[0]                                          # (S, D) bf16, Q pre-scaled
    k = k_ref[0]
    v = v_ref[0]

    # Additive mask bias built in-kernel (no f32 bias array streamed from HBM).
    bias = jnp.where(mask_ref[...] == 0, jnp.float32(-1e30), jnp.float32(0.0))

    outs = []
    for h in range(n_heads):                              # static unroll over heads
        sl = slice(h * hd, (h + 1) * hd)
        qh, kh, vh = q[:, sl], k[:, sl], v[:, sl]         # (S, hd) bf16 views

        # scores: contract head_dim directly -> no explicit K transpose.
        s = jax.lax.dot_general(qh, kh, (((1,), (1,)), ((), ())),
                                preferred_element_type=jnp.float32)   # (S, S) f32
        s = s + bias

        m = jnp.max(s, axis=-1, keepdims=True)
        p = jnp.exp(s - m)
        denom = jnp.sum(p, axis=-1, keepdims=True)

        oh = jnp.dot(p.astype(jnp.bfloat16), vh,
                     preferred_element_type=jnp.float32)              # (S, hd) f32
        outs.append(oh * pl.reciprocal(denom, approx=True))           # EUP divide

    o_ref[0] = jnp.concatenate(outs, axis=-1).astype(o_ref.dtype)     # (S, D)


# --------------------------------------------------------------------------
# Kernel 3: O-projection + residual + RMSNorm2 + MLP (SwiGLU) + residual.
# --------------------------------------------------------------------------
def _mlp_kernel(x_ref, a_ref, wo_ref, bo_ref, g2_ref,
                w1_ref, b1_ref, wg_ref, bg_ref, w2_ref, b2_ref,
                o_ref, *, eps: float):
    x = x_ref[...]                                        # (tm, D) f32 residual
    a = a_ref[...]                                        # (tm, D) bf16 attention out

    attn_x = x + jnp.dot(a, wo_ref[...],
                         preferred_element_type=jnp.float32) + bo_ref[...]

    ms = jnp.mean(attn_x * attn_x, axis=-1, keepdims=True)
    rn = (attn_x * jax.lax.rsqrt(ms + eps) * g2_ref[...]).astype(jnp.bfloat16)

    h1 = jnp.dot(rn, w1_ref[...], preferred_element_type=jnp.float32) + b1_ref[...]
    g = jnp.dot(h1.astype(jnp.bfloat16), wg_ref[...],      # bf16 only at MXU boundary
                preferred_element_type=jnp.float32) + bg_ref[...]
    act = (h1 * (g * jax.nn.sigmoid(g))).astype(jnp.bfloat16)   # h * silu(gate(h))
    h2 = jnp.dot(act, w2_ref[...], preferred_element_type=jnp.float32) + b2_ref[...]

    o_ref[...] = attn_x + h2


# --------------------------------------------------------------------------
# Parameter preparation (one-time: bf16 casts + fused QKV weight).
# --------------------------------------------------------------------------
def prepare_block_params(params):
    """Cast matmul weights to bf16 and concat Q/K/V once, outside the forward."""
    bf = lambda w: w.astype(jnp.bfloat16)
    return {
        "g1": params["g1"].astype(jnp.float32),
        "g2": params["g2"].astype(jnp.float32),
        "wqkv": jnp.concatenate(
            [params["wq"], params["wk"], params["wv"]], axis=1).astype(jnp.bfloat16),
        "bqkv": jnp.concatenate(
            [params["bq"], params["bk"], params["bv"]], axis=1).astype(jnp.float32),
        "wo": bf(params["wo"]), "bo": params["bo"].astype(jnp.float32),
        "w1": bf(params["w1"]), "b1": params["b1"].astype(jnp.float32),
        "wg": bf(params["wg"]), "bg": params["bg"].astype(jnp.float32),
        "w2": bf(params["w2"]), "b2": params["b2"].astype(jnp.float32),
    }


# --------------------------------------------------------------------------
# Wrapper
# --------------------------------------------------------------------------
def slopgpt_transformer_block(x, mask, params, *, n_heads):
    """x: (B, S, D) f32, mask: (S, S) int (1=keep, 0=mask).
    params: output of prepare_block_params(). Returns (B, S, D) f32."""
    B, S, D = x.shape
    assert D % n_heads == 0
    hd = D // n_heads
    E = MLP_EXPANSION_FACTOR * D
    BS = B * S

    vmem_limit = _vmem_limit_bytes()
    tm = _choose_row_tile(BS, vmem_limit)
    n_row_tiles = pl.cdiv(BS, tm)

    row_params = pltpu.CompilerParams(
        dimension_semantics=("parallel",), vmem_limit_bytes=vmem_limit)
    attn_params = pltpu.CompilerParams(
        dimension_semantics=("parallel",), vmem_limit_bytes=vmem_limit)

    x_rows = x.reshape(BS, D)
    row_spec = pl.BlockSpec((tm, D), lambda i: (i, 0))

    # ---- stage 1: RMSNorm1 + fused QKV projection (row-tiled over B*S) ----
    q, k, v = pl.pallas_call(
        functools.partial(_qkv_kernel, eps=RMS_NORM_EPS,
                          scale=1.0 / math.sqrt(hd)),
        out_shape=[jax.ShapeDtypeStruct((BS, D), jnp.bfloat16)] * 3,
        grid_spec=pltpu.PrefetchScalarGridSpec(
            num_scalar_prefetch=0,
            grid=(n_row_tiles,),
            in_specs=[
                row_spec,                               # x rows
                _resident_spec((1, D)),                 # g1
                _resident_spec((D, 3 * D)),             # fused Wqkv^T (bf16)
                _resident_spec((1, 3 * D)),             # fused bias
            ],
            out_specs=[row_spec] * 3,
        ),
        compiler_params=row_params,
    )(x_rows, params["g1"], params["wqkv"], params["bqkv"])

    # ---- stage 2: attention; one batch per grid step, heads handled in-kernel.
    # q/k/v/attn all keep the (B, S, D) row layout -> no HBM transposes.
    batch_spec = pl.BlockSpec((1, S, D), lambda b: (b, 0, 0))
    attn = pl.pallas_call(
        functools.partial(_attn_kernel, n_heads=n_heads),
        out_shape=jax.ShapeDtypeStruct((B, S, D), jnp.bfloat16),
        grid_spec=pltpu.PrefetchScalarGridSpec(
            num_scalar_prefetch=0,
            grid=(B,),
            in_specs=[
                _resident_spec((S, S)),                 # int mask, resident
                batch_spec, batch_spec, batch_spec,     # q, k, v (B, S, D)
            ],
            out_specs=batch_spec,
        ),
        compiler_params=attn_params,
    )(mask, q.reshape(B, S, D), k.reshape(B, S, D), v.reshape(B, S, D))

    # ---- stage 3: O-proj + residual + RMSNorm2 + MLP + residual ----
    out_rows = pl.pallas_call(
        functools.partial(_mlp_kernel, eps=RMS_NORM_EPS),
        out_shape=jax.ShapeDtypeStruct((BS, D), jnp.float32),
        grid_spec=pltpu.PrefetchScalarGridSpec(
            num_scalar_prefetch=0,
            grid=(n_row_tiles,),
            in_specs=[
                row_spec,                               # x rows (residual)
                row_spec,                               # attention rows (bf16)
                _resident_spec((D, D)), _resident_spec((1, D)),   # Wo^T, bo
                _resident_spec((1, D)),                           # g2
                _resident_spec((D, E)), _resident_spec((1, E)),   # W1^T, b1
                _resident_spec((E, E)), _resident_spec((1, E)),   # Wg^T, bg (gate)
                _resident_spec((E, D)), _resident_spec((1, D)),   # W2^T, b2
            ],
            out_specs=row_spec,
        ),
        compiler_params=row_params,
    )(x_rows, attn.reshape(BS, D),
      params["wo"], params["bo"], params["g2"],
      params["w1"], params["b1"], params["wg"], params["bg"],
      params["w2"], params["b2"])

    return out_rows.reshape(B, S, D)


# --------------------------------------------------------------------------
# Pure-JAX f32 replica of the PyTorch forward (correctness reference).
# --------------------------------------------------------------------------
def _reference(x, mask, params, *, n_heads):
    B, S, D = x.shape
    hd = D // n_heads
    eps = RMS_NORM_EPS

    def rms(v, g):
        return v * jax.lax.rsqrt(jnp.mean(v * v, -1, keepdims=True) + eps) * g

    xn = rms(x, params["g1"][0])
    q = xn @ params["wq"] + params["bq"][0]
    k = xn @ params["wk"] + params["bk"][0]
    v = xn @ params["wv"] + params["bv"][0]
    q = q.reshape(B, S, n_heads, hd).transpose(0, 2, 1, 3)
    k = k.reshape(B, S, n_heads, hd).transpose(0, 2, 1, 3)
    v = v.reshape(B, S, n_heads, hd).transpose(0, 2, 1, 3)
    s = jnp.einsum("bhqd,bhkd->bhqk", q, k) / math.sqrt(hd)
    s = jnp.where(mask[None, None] == 0, -jnp.inf, s)
    p = jax.nn.softmax(s, axis=-1)
    ao = jnp.einsum("bhqk,bhkd->bhqd", p, v).transpose(0, 2, 1, 3).reshape(B, S, D)
    attn_x = x + ao @ params["wo"] + params["bo"][0]
    rn = rms(attn_x, params["g2"][0])
    h1 = rn @ params["w1"] + params["b1"][0]
    g = h1 @ params["wg"] + params["bg"][0]
    act = h1 * (g * jax.nn.sigmoid(g))
    h2 = act @ params["w2"] + params["b2"][0]
    return attn_x + h2


def make_params(key, D, E):
    ks = jax.random.split(key, 16)
    scale = 0.05
    return {
        "g1": jnp.ones((1, D), jnp.float32),
        "g2": jnp.ones((1, D), jnp.float32),
        "wq": scale * jax.random.normal(ks[0], (D, D), jnp.float32),
        "bq": scale * jax.random.normal(ks[1], (1, D), jnp.float32),
        "wk": scale * jax.random.normal(ks[2], (D, D), jnp.float32),
        "bk": scale * jax.random.normal(ks[3], (1, D), jnp.float32),
        "wv": scale * jax.random.normal(ks[4], (D, D), jnp.float32),
        "bv": scale * jax.random.normal(ks[5], (1, D), jnp.float32),
        "wo": scale * jax.random.normal(ks[6], (D, D), jnp.float32),
        "bo": scale * jax.random.normal(ks[7], (1, D), jnp.float32),
        "w1": scale * jax.random.normal(ks[8], (D, E), jnp.float32),
        "b1": scale * jax.random.normal(ks[9], (1, E), jnp.float32),
        "wg": scale * jax.random.normal(ks[10], (E, E), jnp.float32),
        "bg": scale * jax.random.normal(ks[11], (1, E), jnp.float32),
        "w2": scale * jax.random.normal(ks[12], (E, D), jnp.float32),
        "b2": scale * jax.random.normal(ks[13], (1, D), jnp.float32),
    }


if __name__ == "__main__":
    B, S, D, H = 2, 8, 32, 4
    E = MLP_EXPANSION_FACTOR * D

    key = jax.random.PRNGKey(0)
    kx, kp = jax.random.split(key)
    x = jax.random.normal(kx, (B, S, D), jnp.float32)
    # causal mask broadcast over batch & heads (1 = attend, 0 = masked)
    mask = jnp.tril(jnp.ones((S, S), jnp.int32))

    raw_params = make_params(kp, D, E)
    prepared = prepare_block_params(raw_params)          # one-time bf16 cast / fuse

    fwd = jax.jit(functools.partial(slopgpt_transformer_block, n_heads=H))
    out = jax.block_until_ready(fwd(x, mask, prepared))

    ref = _reference(x, mask, raw_params, n_heads=H)
    assert out.shape == (B, S, D)
    # bf16 matmul operands (f32 accumulation) + approx reciprocal vs f32 reference.
    max_err = float(jnp.max(jnp.abs(out - ref)))
    assert jnp.allclose(out, ref, atol=3e-2, rtol=3e-2), max_err

    print("KERNEL_OK")
</pallas_src>

<mosaic_0001>
module attributes {stable_mosaic.version = 11 : i64} {
  func.func @_mlp_kernel(%arg0: i32, %arg1: memref<16x32xf32, #tpu.memory_space<vmem>>, %arg2: memref<16x32xbf16, #tpu.memory_space<vmem>>, %arg3: memref<32x32xbf16, #tpu.memory_space<vmem>>, %arg4: memref<1x32xf32, #tpu.memory_space<vmem>>, %arg5: memref<1x32xf32, #tpu.memory_space<vmem>>, %arg6: memref<32x128xbf16, #tpu.memory_space<vmem>>, %arg7: memref<1x128xf32, #tpu.memory_space<vmem>>, %arg8: memref<128x128xbf16, #tpu.memory_space<vmem>>, %arg9: memref<1x128xf32, #tpu.memory_space<vmem>>, %arg10: memref<128x32xbf16, #tpu.memory_space<vmem>>, %arg11: memref<1x32xf32, #tpu.memory_space<vmem>>, %arg12: memref<16x32xf32, #tpu.memory_space<vmem>>) attributes {dimension_semantics = [#tpu.dimension_semantics<parallel>], iteration_bounds = array<i64: 1>, scalar_prefetch = 0 : i64, scratch_operands = 0 : i64, tpu.core_type = #tpu.core_type<tc>, window_params = [{transform_indices = @transform_0, window_bounds = array<i64: 16, 32>}, {transform_indices = @transform_1, window_bounds = array<i64: 16, 32>}, {pipeline_mode = #tpu.pipeline_mode<synchronous>, transform_indices = @transform_2, window_bounds = array<i64: 32, 32>}, {pipeline_mode = #tpu.pipeline_mode<synchronous>, transform_indices = @transform_3, window_bounds = array<i64: 1, 32>}, {pipeline_mode = #tpu.pipeline_mode<synchronous>, transform_indices = @transform_4, window_bounds = array<i64: 1, 32>}, {pipeline_mode = #tpu.pipeline_mode<synchronous>, transform_indices = @transform_5, window_bounds = array<i64: 32, 128>}, {pipeline_mode = #tpu.pipeline_mode<synchronous>, transform_indices = @transform_6, window_bounds = array<i64: 1, 128>}, {pipeline_mode = #tpu.pipeline_mode<synchronous>, transform_indices = @transform_7, window_bounds = array<i64: 128, 128>}, {pipeline_mode = #tpu.pipeline_mode<synchronous>, transform_indices = @transform_8, window_bounds = array<i64: 1, 128>}, {pipeline_mode = #tpu.pipeline_mode<synchronous>, transform_indices = @transform_9, window_bounds = array<i64: 128, 32>}, {pipeline_mode = #tpu.pipeline_mode<synchronous>, transform_indices = @transform_10, window_bounds = array<i64: 1, 32>}, {transform_indices = @transform_11, window_bounds = array<i64: 16, 32>}]} {
    %c0 = arith.constant 0 : index
    %c0_0 = arith.constant 0 : index
    %0 = vector.load %arg1[%c0, %c0_0] : memref<16x32xf32, #tpu.memory_space<vmem>>, vector<16x32xf32>
    %c0_1 = arith.constant 0 : index
    %c0_2 = arith.constant 0 : index
    %1 = vector.load %arg2[%c0_1, %c0_2] : memref<16x32xbf16, #tpu.memory_space<vmem>>, vector<16x32xbf16>
    %c0_3 = arith.constant 0 : index
    %c0_4 = arith.constant 0 : index
    %2 = vector.load %arg3[%c0_3, %c0_4] : memref<32x32xbf16, #tpu.memory_space<vmem>>, vector<32x32xbf16>
    %cst = arith.constant dense<0.000000e+00> : vector<16x32xf32>
    %3 = tpu.matmul %1, %2, %cst {dimension_numbers = #tpu.dot_dimension_numbers<[1], [0], [0], [1], [0, 0, 1, 1], [], []>} : vector<16x32xbf16>, vector<32x32xbf16>, vector<16x32xf32> -> vector<16x32xf32>
    %4 = arith.addf %0, %3 : vector<16x32xf32>
    %c0_5 = arith.constant 0 : index
    %c0_6 = arith.constant 0 : index
    %5 = vector.load %arg4[%c0_5, %c0_6] : memref<1x32xf32, #tpu.memory_space<vmem>>, vector<1x32xf32>
    %6 = vector.broadcast %5 : vector<1x32xf32> to vector<16x32xf32>
    %7 = arith.addf %4, %6 : vector<16x32xf32>
    %8 = arith.mulf %7, %7 : vector<16x32xf32>
    %cst_7 = arith.constant dense<0.000000e+00> : vector<16xf32>
    %9 = vector.multi_reduction <add>, %8, %cst_7 [1] : vector<16x32xf32> to vector<16xf32>
    %10 = vector.shape_cast %9 : vector<16xf32> to vector<16x1xf32>
    %cst_8 = arith.constant 3.200000e+01 : f32
    %11 = vector.broadcast %cst_8 : f32 to vector<16x1xf32>
    %12 = arith.divf %10, %11 : vector<16x1xf32>
    %cst_9 = arith.constant 9.99999997E-7 : f32
    %13 = vector.broadcast %cst_9 : f32 to vector<16x1xf32>
    %14 = arith.addf %12, %13 : vector<16x1xf32>
    %15 = math.rsqrt %14 : vector<16x1xf32>
    %16 = vector.broadcast %15 : vector<16x1xf32> to vector<16x32xf32>
    %17 = arith.mulf %7, %16 : vector<16x32xf32>
    %c0_10 = arith.constant 0 : index
    %c0_11 = arith.constant 0 : index
    %18 = vector.load %arg5[%c0_10, %c0_11] : memref<1x32xf32, #tpu.memory_space<vmem>>, vector<1x32xf32>
    %19 = vector.broadcast %18 : vector<1x32xf32> to vector<16x32xf32>
    %20 = arith.mulf %17, %19 : vector<16x32xf32>
    %21 = arith.truncf %20 : vector<16x32xf32> to vector<16x32xbf16>
    %c0_12 = arith.constant 0 : index
    %c0_13 = arith.constant 0 : index
    %22 = vector.load %arg6[%c0_12, %c0_13] : memref<32x128xbf16, #tpu.memory_space<vmem>>, vector<32x128xbf16>
    %cst_14 = arith.constant dense<0.000000e+00> : vector<16x128xf32>
    %23 = tpu.matmul %21, %22, %cst_14 {dimension_numbers = #tpu.dot_dimension_numbers<[1], [0], [0], [1], [0, 0, 1, 1], [], []>} : vector<16x32xbf16>, vector<32x128xbf16>, vector<16x128xf32> -> vector<16x128xf32>
    %c0_15 = arith.constant 0 : index
    %c0_16 = arith.constant 0 : index
    %24 = vector.load %arg7[%c0_15, %c0_16] : memref<1x128xf32, #tpu.memory_space<vmem>>, vector<1x128xf32>
    %25 = vector.broadcast %24 : vector<1x128xf32> to vector<16x128xf32>
    %26 = arith.addf %23, %25 : vector<16x128xf32>
    %27 = arith.truncf %26 : vector<16x128xf32> to vector<16x128xbf16>
    %c0_17 = arith.constant 0 : index
    %c0_18 = arith.constant 0 : index
    %28 = vector.load %arg8[%c0_17, %c0_18] : memref<128x128xbf16, #tpu.memory_space<vmem>>, vector<128x128xbf16>
    %cst_19 = arith.constant dense<0.000000e+00> : vector<16x128xf32>
    %29 = tpu.matmul %27, %28, %cst_19 {dimension_numbers = #tpu.dot_dimension_numbers<[1], [0], [0], [1], [0, 0, 1, 1], [], []>} : vector<16x128xbf16>, vector<128x128xbf16>, vector<16x128xf32> -> vector<16x128xf32>
    %c0_20 = arith.constant 0 : index
    %c0_21 = arith.constant 0 : index
    %30 = vector.load %arg9[%c0_20, %c0_21] : memref<1x128xf32, #tpu.memory_space<vmem>>, vector<1x128xf32>
    %31 = vector.broadcast %30 : vector<1x128xf32> to vector<16x128xf32>
    %32 = arith.addf %29, %31 : vector<16x128xf32>
    %33 = arith.negf %32 : vector<16x128xf32>
    %34 = math.exp %33 : vector<16x128xf32>
    %cst_22 = arith.constant 1.000000e+00 : f32
    %35 = vector.broadcast %cst_22 : f32 to vector<16x128xf32>
    %36 = arith.addf %35, %34 : vector<16x128xf32>
    %37 = arith.divf %35, %36 : vector<16x128xf32>
    %38 = arith.mulf %32, %37 : vector<16x128xf32>
    %39 = arith.mulf %26, %38 : vector<16x128xf32>
    %40 = arith.truncf %39 : vector<16x128xf32> to vector<16x128xbf16>
    %c0_23 = arith.constant 0 : index
    %c0_24 = arith.constant 0 : index
    %41 = vector.load %arg10[%c0_23, %c0_24] : memref<128x32xbf16, #tpu.memory_space<vmem>>, vector<128x32xbf16>
    %cst_25 = arith.constant dense<0.000000e+00> : vector<16x32xf32>
    %42 = tpu.matmul %40, %41, %cst_25 {dimension_numbers = #tpu.dot_dimension_numbers<[1], [0], [0], [1], [0, 0, 1, 1], [], []>} : vector<16x128xbf16>, vector<128x32xbf16>, vector<16x32xf32> -> vector<16x32xf32>
    %c0_26 = arith.constant 0 : index
    %c0_27 = arith.constant 0 : index
    %43 = vector.load %arg11[%c0_26, %c0_27] : memref<1x32xf32, #tpu.memory_space<vmem>>, vector<1x32xf32>
    %44 = vector.broadcast %43 : vector<1x32xf32> to vector<16x32xf32>
    %45 = arith.addf %42, %44 : vector<16x32xf32>
    %46 = arith.addf %7, %45 : vector<16x32xf32>
    %c0_28 = arith.constant 0 : index
    %c0_29 = arith.constant 0 : index
    %47 = vector.load %arg12[%c0_28, %c0_29] : memref<16x32xf32, #tpu.memory_space<vmem>>, vector<16x32xf32>
    tpu.vector_store %arg12[%c0_28, %c0_29], %46 {strides = array<i32>} : memref<16x32xf32, #tpu.memory_space<vmem>>, vector<16x32xf32>,
    return
  }
  func.func @transform_0(%arg0: i32) -> (i32, i32) {
    %c0_i32 = arith.constant 0 : i32
    %c0_i32_0 = arith.constant 0 : i32
    return %arg0, %c0_i32 : i32, i32
  }
  func.func @transform_1(%arg0: i32) -> (i32, i32) {
    %c0_i32 = arith.constant 0 : i32
    %c0_i32_0 = arith.constant 0 : i32
    return %arg0, %c0_i32 : i32, i32
  }
  func.func @transform_2(%arg0: i32) -> (i32, i32) {
    %c0_i32 = arith.constant 0 : i32
    %c0_i32_0 = arith.constant 0 : i32
    %c0_i32_1 = arith.constant 0 : i32
    return %c0_i32, %c0_i32_0 : i32, i32
  }
  func.func @transform_3(%arg0: i32) -> (i32, i32) {
    %c0_i32 = arith.constant 0 : i32
    %c0_i32_0 = arith.constant 0 : i32
    %c0_i32_1 = arith.constant 0 : i32
    return %c0_i32, %c0_i32_0 : i32, i32
  }
  func.func @transform_4(%arg0: i32) -> (i32, i32) {
    %c0_i32 = arith.constant 0 : i32
    %c0_i32_0 = arith.constant 0 : i32
    %c0_i32_1 = arith.constant 0 : i32
    return %c0_i32, %c0_i32_0 : i32, i32
  }
  func.func @transform_5(%arg0: i32) -> (i32, i32) {
    %c0_i32 = arith.constant 0 : i32
    %c0_i32_0 = arith.constant 0 : i32
    %c0_i32_1 = arith.constant 0 : i32
    return %c0_i32, %c0_i32_0 : i32, i32
  }
  func.func @transform_6(%arg0: i32) -> (i32, i32) {
    %c0_i32 = arith.constant 0 : i32
    %c0_i32_0 = arith.constant 0 : i32
    %c0_i32_1 = arith.constant 0 : i32
    return %c0_i32, %c0_i32_0 : i32, i32
  }
  func.func @transform_7(%arg0: i32) -> (i32, i32) {
    %c0_i32 = arith.constant 0 : i32
    %c0_i32_0 = arith.constant 0 : i32
    %c0_i32_1 = arith.constant 0 : i32
    return %c0_i32, %c0_i32_0 : i32, i32
  }
  func.func @transform_8(%arg0: i32) -> (i32, i32) {
    %c0_i32 = arith.constant 0 : i32
    %c0_i32_0 = arith.constant 0 : i32
    %c0_i32_1 = arith.constant 0 : i32
    return %c0_i32, %c0_i32_0 : i32, i32
  }
  func.func @transform_9(%arg0: i32) -> (i32, i32) {
    %c0_i32 = arith.constant 0 : i32
    %c0_i32_0 = arith.constant 0 : i32
    %c0_i32_1 = arith.constant 0 : i32
    return %c0_i32, %c0_i32_0 : i32, i32
  }
  func.func @transform_10(%arg0: i32) -> (i32, i32) {
    %c0_i32 = arith.constant 0 : i32
    %c0_i32_0 = arith.constant 0 : i32
    %c0_i32_1 = arith.constant 0 : i32
    return %c0_i32, %c0_i32_0 : i32, i32
  }
  func.func @transform_11(%arg0: i32) -> (i32, i32) {
    %c0_i32 = arith.constant 0 : i32
    %c0_i32_0 = arith.constant 0 : i32
    return %arg0, %c0_i32 : i32, i32
  }
}

module attributes {stable_mosaic.version = 11 : i64} {
  func.func @_attn_kernel(%arg0: i32, %arg1: memref<8x8xi32, #tpu.memory_space<vmem>>, %arg2: memref<1x8x32xbf16, #tpu.memory_space<vmem>>, %arg3: memref<1x8x32xbf16, #tpu.memory_space<vmem>>, %arg4: memref<1x8x32xbf16, #tpu.memory_space<vmem>>, %arg5: memref<1x8x32xbf16, #tpu.memory_space<vmem>>) attributes {dimension_semantics = [#tpu.dimension_semantics<parallel>], iteration_bounds = array<i64: 2>, scalar_prefetch = 0 : i64, scratch_operands = 0 : i64, tpu.core_type = #tpu.core_type<tc>, window_params = [{pipeline_mode = #tpu.pipeline_mode<synchronous>, transform_indices = @transform_0, window_bounds = array<i64: 8, 8>}, {transform_indices = @transform_1, window_bounds = array<i64: 1, 8, 32>}, {transform_indices = @transform_2, window_bounds = array<i64: 1, 8, 32>}, {transform_indices = @transform_3, window_bounds = array<i64: 1, 8, 32>}, {transform_indices = @transform_4, window_bounds = array<i64: 1, 8, 32>}]} {
    %c0 = arith.constant 0 : index
    %c0_0 = arith.constant 0 : index
    %c0_1 = arith.constant 0 : index
    %0 = vector.load %arg2[%c0, %c0_0, %c0_1] : memref<1x8x32xbf16, #tpu.memory_space<vmem>>, vector<1x8x32xbf16>
    %1 = vector.shape_cast %0 : vector<1x8x32xbf16> to vector<8x32xbf16>
    %c0_2 = arith.constant 0 : index
    %c0_3 = arith.constant 0 : index
    %c0_4 = arith.constant 0 : index
    %2 = vector.load %arg3[%c0_2, %c0_3, %c0_4] : memref<1x8x32xbf16, #tpu.memory_space<vmem>>, vector<1x8x32xbf16>
    %3 = vector.shape_cast %2 : vector<1x8x32xbf16> to vector<8x32xbf16>
    %c0_5 = arith.constant 0 : index
    %c0_6 = arith.constant 0 : index
    %c0_7 = arith.constant 0 : index
    %4 = vector.load %arg4[%c0_5, %c0_6, %c0_7] : memref<1x8x32xbf16, #tpu.memory_space<vmem>>, vector<1x8x32xbf16>
    %5 = vector.shape_cast %4 : vector<1x8x32xbf16> to vector<8x32xbf16>
    %c0_8 = arith.constant 0 : index
    %c0_9 = arith.constant 0 : index
    %6 = vector.load %arg1[%c0_8, %c0_9] : memref<8x8xi32, #tpu.memory_space<vmem>>, vector<8x8xi32>
    %c0_i32 = arith.constant 0 : i32
    %7 = vector.broadcast %c0_i32 : i32 to vector<8x8xi32>
    %8 = arith.cmpi eq, %6, %7 : vector<8x8xi32>
    %cst = arith.constant -1.000000e+30 : f32
    %cst_10 = arith.constant 0.000000e+00 : f32
    %9 = vector.broadcast %cst : f32 to vector<8x8xf32>
    %10 = vector.broadcast %cst_10 : f32 to vector<8x8xf32>
    %11 = arith.select %8, %9, %10 : vector<8x8xi1>, vector<8x8xf32>
    %12 = vector.extract_strided_slice %1 {offsets = [0, 0], sizes = [8, 8], strides = [1, 1]} : vector<8x32xbf16> to vector<8x8xbf16>
    %13 = vector.extract_strided_slice %3 {offsets = [0, 0], sizes = [8, 8], strides = [1, 1]} : vector<8x32xbf16> to vector<8x8xbf16>
    %14 = vector.extract_strided_slice %5 {offsets = [0, 0], sizes = [8, 8], strides = [1, 1]} : vector<8x32xbf16> to vector<8x8xbf16>
    %cst_11 = arith.constant dense<0.000000e+00> : vector<8x8xf32>
    %15 = tpu.matmul %12, %13, %cst_11 {dimension_numbers = #tpu.dot_dimension_numbers<[1], [1], [0], [0], [0, 0, 1, 0], [], []>} : vector<8x8xbf16>, vector<8x8xbf16>, vector<8x8xf32> -> vector<8x8xf32>
    %16 = arith.addf %15, %11 : vector<8x8xf32>
    %cst_12 = arith.constant dense<0xFF800000> : vector<8xf32>
    %17 = vector.multi_reduction <maximumf>, %16, %cst_12 [1] : vector<8x8xf32> to vector<8xf32>
    %18 = vector.shape_cast %17 : vector<8xf32> to vector<8x1xf32>
    %19 = vector.broadcast %18 : vector<8x1xf32> to vector<8x8xf32>
    %20 = arith.subf %16, %19 : vector<8x8xf32>
    %21 = math.exp %20 : vector<8x8xf32>
    %cst_13 = arith.constant dense<0.000000e+00> : vector<8xf32>
    %22 = vector.multi_reduction <add>, %21, %cst_13 [1] : vector<8x8xf32> to vector<8xf32>
    %23 = vector.shape_cast %22 : vector<8xf32> to vector<8x1xf32>
    %24 = arith.truncf %21 : vector<8x8xf32> to vector<8x8xbf16>
    %cst_14 = arith.constant dense<0.000000e+00> : vector<8x8xf32>
    %25 = tpu.matmul %24, %14, %cst_14 {dimension_numbers = #tpu.dot_dimension_numbers<[1], [0], [0], [1], [0, 0, 1, 1], [], []>} : vector<8x8xbf16>, vector<8x8xbf16>, vector<8x8xf32> -> vector<8x8xf32>
    %26 = tpu.reciprocal %23 {approx = true} : vector<8x1xf32> -> vector<8x1xf32>
    %27 = vector.broadcast %26 : vector<8x1xf32> to vector<8x8xf32>
    %28 = arith.mulf %25, %27 : vector<8x8xf32>
    %29 = vector.extract_strided_slice %1 {offsets = [0, 8], sizes = [8, 8], strides = [1, 1]} : vector<8x32xbf16> to vector<8x8xbf16>
    %30 = vector.extract_strided_slice %3 {offsets = [0, 8], sizes = [8, 8], strides = [1, 1]} : vector<8x32xbf16> to vector<8x8xbf16>
    %31 = vector.extract_strided_slice %5 {offsets = [0, 8], sizes = [8, 8], strides = [1, 1]} : vector<8x32xbf16> to vector<8x8xbf16>
    %cst_15 = arith.constant dense<0.000000e+00> : vector<8x8xf32>
    %32 = tpu.matmul %29, %30, %cst_15 {dimension_numbers = #tpu.dot_dimension_numbers<[1], [1], [0], [0], [0, 0, 1, 0], [], []>} : vector<8x8xbf16>, vector<8x8xbf16>, vector<8x8xf32> -> vector<8x8xf32>
    %33 = arith.addf %32, %11 : vector<8x8xf32>
    %cst_16 = arith.constant dense<0xFF800000> : vector<8xf32>
    %34 = vector.multi_reduction <maximumf>, %33, %cst_16 [1] : vector<8x8xf32> to vector<8xf32>
    %35 = vector.shape_cast %34 : vector<8xf32> to vector<8x1xf32>
    %36 = vector.broadcast %35 : vector<8x1xf32> to vector<8x8xf32>
    %37 = arith.subf %33, %36 : vector<8x8xf32>
    %38 = math.exp %37 : vector<8x8xf32>
    %cst_17 = arith.constant dense<0.000000e+00> : vector<8xf32>
    %39 = vector.multi_reduction <add>, %38, %cst_17 [1] : vector<8x8xf32> to vector<8xf32>
    %40 = vector.shape_cast %39 : vector<8xf32> to vector<8x1xf32>
    %41 = arith.truncf %38 : vector<8x8xf32> to vector<8x8xbf16>
    %cst_18 = arith.constant dense<0.000000e+00> : vector<8x8xf32>
    %42 = tpu.matmul %41, %31, %cst_18 {dimension_numbers = #tpu.dot_dimension_numbers<[1], [0], [0], [1], [0, 0, 1, 1], [], []>} : vector<8x8xbf16>, vector<8x8xbf16>, vector<8x8xf32> -> vector<8x8xf32>
    %43 = tpu.reciprocal %40 {approx = true} : vector<8x1xf32> -> vector<8x1xf32>
    %44 = vector.broadcast %43 : vector<8x1xf32> to vector<8x8xf32>
    %45 = arith.mulf %42, %44 : vector<8x8xf32>
    %46 = vector.extract_strided_slice %1 {offsets = [0, 16], sizes = [8, 8], strides = [1, 1]} : vector<8x32xbf16> to vector<8x8xbf16>
    %47 = vector.extract_strided_slice %3 {offsets = [0, 16], sizes = [8, 8], strides = [1, 1]} : vector<8x32xbf16> to vector<8x8xbf16>
    %48 = vector.extract_strided_slice %5 {offsets = [0, 16], sizes = [8, 8], strides = [1, 1]} : vector<8x32xbf16> to vector<8x8xbf16>
    %cst_19 = arith.constant dense<0.000000e+00> : vector<8x8xf32>
    %49 = tpu.matmul %46, %47, %cst_19 {dimension_numbers = #tpu.dot_dimension_numbers<[1], [1], [0], [0], [0, 0, 1, 0], [], []>} : vector<8x8xbf16>, vector<8x8xbf16>, vector<8x8xf32> -> vector<8x8xf32>
    %50 = arith.addf %49, %11 : vector<8x8xf32>
    %cst_20 = arith.constant dense<0xFF800000> : vector<8xf32>
    %51 = vector.multi_reduction <maximumf>, %50, %cst_20 [1] : vector<8x8xf32> to vector<8xf32>
    %52 = vector.shape_cast %51 : vector<8xf32> to vector<8x1xf32>
    %53 = vector.broadcast %52 : vector<8x1xf32> to vector<8x8xf32>
    %54 = arith.subf %50, %53 : vector<8x8xf32>
    %55 = math.exp %54 : vector<8x8xf32>
    %cst_21 = arith.constant dense<0.000000e+00> : vector<8xf32>
    %56 = vector.multi_reduction <add>, %55, %cst_21 [1] : vector<8x8xf32> to vector<8xf32>
    %57 = vector.shape_cast %56 : vector<8xf32> to vector<8x1xf32>
    %58 = arith.truncf %55 : vector<8x8xf32> to vector<8x8xbf16>
    %cst_22 = arith.constant dense<0.000000e+00> : vector<8x8xf32>
    %59 = tpu.matmul %58, %48, %cst_22 {dimension_numbers = #tpu.dot_dimension_numbers<[1], [0], [0], [1], [0, 0, 1, 1], [], []>} : vector<8x8xbf16>, vector<8x8xbf16>, vector<8x8xf32> -> vector<8x8xf32>
    %60 = tpu.reciprocal %57 {approx = true} : vector<8x1xf32> -> vector<8x1xf32>
    %61 = vector.broadcast %60 : vector<8x1xf32> to vector<8x8xf32>
    %62 = arith.mulf %59, %61 : vector<8x8xf32>
    %63 = vector.extract_strided_slice %1 {offsets = [0, 24], sizes = [8, 8], strides = [1, 1]} : vector<8x32xbf16> to vector<8x8xbf16>
    %64 = vector.extract_strided_slice %3 {offsets = [0, 24], sizes = [8, 8], strides = [1, 1]} : vector<8x32xbf16> to vector<8x8xbf16>
    %65 = vector.extract_strided_slice %5 {offsets = [0, 24], sizes = [8, 8], strides = [1, 1]} : vector<8x32xbf16> to vector<8x8xbf16>
    %cst_23 = arith.constant dense<0.000000e+00> : vector<8x8xf32>
    %66 = tpu.matmul %63, %64, %cst_23 {dimension_numbers = #tpu.dot_dimension_numbers<[1], [1], [0], [0], [0, 0, 1, 0], [], []>} : vector<8x8xbf16>, vector<8x8xbf16>, vector<8x8xf32> -> vector<8x8xf32>
    %67 = arith.addf %66, %11 : vector<8x8xf32>
    %cst_24 = arith.constant dense<0xFF800000> : vector<8xf32>
    %68 = vector.multi_reduction <maximumf>, %67, %cst_24 [1] : vector<8x8xf32> to vector<8xf32>
    %69 = vector.shape_cast %68 : vector<8xf32> to vector<8x1xf32>
    %70 = vector.broadcast %69 : vector<8x1xf32> to vector<8x8xf32>
    %71 = arith.subf %67, %70 : vector<8x8xf32>
    %72 = math.exp %71 : vector<8x8xf32>
    %cst_25 = arith.constant dense<0.000000e+00> : vector<8xf32>
    %73 = vector.multi_reduction <add>, %72, %cst_25 [1] : vector<8x8xf32> to vector<8xf32>
    %74 = vector.shape_cast %73 : vector<8xf32> to vector<8x1xf32>
    %75 = arith.truncf %72 : vector<8x8xf32> to vector<8x8xbf16>
    %cst_26 = arith.constant dense<0.000000e+00> : vector<8x8xf32>
    %76 = tpu.matmul %75, %65, %cst_26 {dimension_numbers = #tpu.dot_dimension_numbers<[1], [0], [0], [1], [0, 0, 1, 1], [], []>} : vector<8x8xbf16>, vector<8x8xbf16>, vector<8x8xf32> -> vector<8x8xf32>
    %77 = tpu.reciprocal %74 {approx = true} : vector<8x1xf32> -> vector<8x1xf32>
    %78 = vector.broadcast %77 : vector<8x1xf32> to vector<8x8xf32>
    %79 = arith.mulf %76, %78 : vector<8x8xf32>
    %80 = tpu.concatenate %28, %45, %62, %79 in 1 : vector<8x8xf32>, vector<8x8xf32>, vector<8x8xf32>, vector<8x8xf32> -> vector<8x32xf32>
    %81 = arith.truncf %80 : vector<8x32xf32> to vector<8x32xbf16>
    %c0_27 = arith.constant 0 : index
    %c0_28 = arith.constant 0 : index
    %c0_29 = arith.constant 0 : index
    %82 = vector.load %arg5[%c0_27, %c0_28, %c0_29] : memref<1x8x32xbf16, #tpu.memory_space<vmem>>, vector<1x8x32xbf16>
    %83 = vector.shape_cast %82 : vector<1x8x32xbf16> to vector<8x32xbf16>
    %84 = vector.shape_cast %81 : vector<8x32xbf16> to vector<1x8x32xbf16>
    tpu.vector_store %arg5[%c0_27, %c0_28, %c0_29], %84 {strides = array<i32>} : memref<1x8x32xbf16, #tpu.memory_space<vmem>>, vector<1x8x32xbf16>,
    return
  }
  func.func @transform_0(%arg0: i32) -> (i32, i32) {
    %c0_i32 = arith.constant 0 : i32
    %c0_i32_0 = arith.constant 0 : i32
    %c0_i32_1 = arith.constant 0 : i32
    return %c0_i32, %c0_i32_0 : i32, i32
  }
  func.func @transform_1(%arg0: i32) -> (i32, i32, i32) {
    %c0_i32 = arith.constant 0 : i32
    %c0_i32_0 = arith.constant 0 : i32
    %c0_i32_1 = arith.constant 0 : i32
    return %arg0, %c0_i32, %c0_i32_0 : i32, i32, i32
  }
  func.func @transform_2(%arg0: i32) -> (i32, i32, i32) {
    %c0_i32 = arith.constant 0 : i32
    %c0_i32_0 = arith.constant 0 : i32
    %c0_i32_1 = arith.constant 0 : i32
    return %arg0, %c0_i32, %c0_i32_0 : i32, i32, i32
  }
  func.func @transform_3(%arg0: i32) -> (i32, i32, i32) {
    %c0_i32 = arith.constant 0 : i32
    %c0_i32_0 = arith.constant 0 : i32
    %c0_i32_1 = arith.constant 0 : i32
    return %arg0, %c0_i32, %c0_i32_0 : i32, i32, i32
  }
  func.func @transform_4(%arg0: i32) -> (i32, i32, i32) {
    %c0_i32 = arith.constant 0 : i32
    %c0_i32_0 = arith.constant 0 : i32
    %c0_i32_1 = arith.constant 0 : i32
    return %arg0, %c0_i32, %c0_i32_0 : i32, i32, i32
  }
}

module attributes {stable_mosaic.version = 11 : i64} {
  func.func @_qkv_kernel(%arg0: i32, %arg1: memref<16x32xf32, #tpu.memory_space<vmem>>, %arg2: memref<1x32xf32, #tpu.memory_space<vmem>>, %arg3: memref<32x96xbf16, #tpu.memory_space<vmem>>, %arg4: memref<1x96xf32, #tpu.memory_space<vmem>>, %arg5: memref<16x32xbf16, #tpu.memory_space<vmem>>, %arg6: memref<16x32xbf16, #tpu.memory_space<vmem>>, %arg7: memref<16x32xbf16, #tpu.memory_space<vmem>>) attributes {dimension_semantics = [#tpu.dimension_semantics<parallel>], iteration_bounds = array<i64: 1>, scalar_prefetch = 0 : i64, scratch_operands = 0 : i64, tpu.core_type = #tpu.core_type<tc>, window_params = [{transform_indices = @transform_0, window_bounds = array<i64: 16, 32>}, {pipeline_mode = #tpu.pipeline_mode<synchronous>, transform_indices = @transform_1, window_bounds = array<i64: 1, 32>}, {pipeline_mode = #tpu.pipeline_mode<synchronous>, transform_indices = @transform_2, window_bounds = array<i64: 32, 96>}, {pipeline_mode = #tpu.pipeline_mode<synchronous>, transform_indices = @transform_3, window_bounds = array<i64: 1, 96>}, {transform_indices = @transform_4, window_bounds = array<i64: 16, 32>}, {transform_indices = @transform_5, window_bounds = array<i64: 16, 32>}, {transform_indices = @transform_6, window_bounds = array<i64: 16, 32>}]} {
    %c0 = arith.constant 0 : index
    %c0_0 = arith.constant 0 : index
    %0 = vector.load %arg1[%c0, %c0_0] : memref<16x32xf32, #tpu.memory_space<vmem>>, vector<16x32xf32>
    %1 = arith.mulf %0, %0 : vector<16x32xf32>
    %cst = arith.constant dense<0.000000e+00> : vector<16xf32>
    %2 = vector.multi_reduction <add>, %1, %cst [1] : vector<16x32xf32> to vector<16xf32>
    %3 = vector.shape_cast %2 : vector<16xf32> to vector<16x1xf32>
    %cst_1 = arith.constant 3.200000e+01 : f32
    %4 = vector.broadcast %cst_1 : f32 to vector<16x1xf32>
    %5 = arith.divf %3, %4 : vector<16x1xf32>
    %cst_2 = arith.constant 9.99999997E-7 : f32
    %6 = vector.broadcast %cst_2 : f32 to vector<16x1xf32>
    %7 = arith.addf %5, %6 : vector<16x1xf32>
    %8 = math.rsqrt %7 : vector<16x1xf32>
    %9 = vector.broadcast %8 : vector<16x1xf32> to vector<16x32xf32>
    %10 = arith.mulf %0, %9 : vector<16x32xf32>
    %c0_3 = arith.constant 0 : index
    %c0_4 = arith.constant 0 : index
    %11 = vector.load %arg2[%c0_3, %c0_4] : memref<1x32xf32, #tpu.memory_space<vmem>>, vector<1x32xf32>
    %12 = vector.broadcast %11 : vector<1x32xf32> to vector<16x32xf32>
    %13 = arith.mulf %10, %12 : vector<16x32xf32>
    %14 = arith.truncf %13 : vector<16x32xf32> to vector<16x32xbf16>
    %c0_5 = arith.constant 0 : index
    %c0_6 = arith.constant 0 : index
    %15 = vector.load %arg3[%c0_5, %c0_6] : memref<32x96xbf16, #tpu.memory_space<vmem>>, vector<32x96xbf16>
    %cst_7 = arith.constant dense<0.000000e+00> : vector<16x96xf32>
    %16 = tpu.matmul %14, %15, %cst_7 {dimension_numbers = #tpu.dot_dimension_numbers<[1], [0], [0], [1], [0, 0, 1, 1], [], []>} : vector<16x32xbf16>, vector<32x96xbf16>, vector<16x96xf32> -> vector<16x96xf32>
    %c0_8 = arith.constant 0 : index
    %c0_9 = arith.constant 0 : index
    %17 = vector.load %arg4[%c0_8, %c0_9] : memref<1x96xf32, #tpu.memory_space<vmem>>, vector<1x96xf32>
    %18 = vector.broadcast %17 : vector<1x96xf32> to vector<16x96xf32>
    %19 = arith.addf %16, %18 : vector<16x96xf32>
    %20 = vector.extract_strided_slice %19 {offsets = [0, 0], sizes = [16, 32], strides = [1, 1]} : vector<16x96xf32> to vector<16x32xf32>
    %cst_10 = arith.constant 0.353553385 : f32
    %21 = vector.broadcast %cst_10 : f32 to vector<16x32xf32>
    %22 = arith.mulf %20, %21 : vector<16x32xf32>
    %23 = arith.truncf %22 : vector<16x32xf32> to vector<16x32xbf16>
    %c0_11 = arith.constant 0 : index
    %c0_12 = arith.constant 0 : index
    %24 = vector.load %arg5[%c0_11, %c0_12] : memref<16x32xbf16, #tpu.memory_space<vmem>>, vector<16x32xbf16>
    tpu.vector_store %arg5[%c0_11, %c0_12], %23 {strides = array<i32>} : memref<16x32xbf16, #tpu.memory_space<vmem>>, vector<16x32xbf16>,
    %25 = vector.extract_strided_slice %19 {offsets = [0, 32], sizes = [16, 32], strides = [1, 1]} : vector<16x96xf32> to vector<16x32xf32>
    %26 = arith.truncf %25 : vector<16x32xf32> to vector<16x32xbf16>
    %c0_13 = arith.constant 0 : index
    %c0_14 = arith.constant 0 : index
    %27 = vector.load %arg6[%c0_13, %c0_14] : memref<16x32xbf16, #tpu.memory_space<vmem>>, vector<16x32xbf16>
    tpu.vector_store %arg6[%c0_13, %c0_14], %26 {strides = array<i32>} : memref<16x32xbf16, #tpu.memory_space<vmem>>, vector<16x32xbf16>,
    %28 = vector.extract_strided_slice %19 {offsets = [0, 64], sizes = [16, 32], strides = [1, 1]} : vector<16x96xf32> to vector<16x32xf32>
    %29 = arith.truncf %28 : vector<16x32xf32> to vector<16x32xbf16>
    %c0_15 = arith.constant 0 : index
    %c0_16 = arith.constant 0 : index
    %30 = vector.load %arg7[%c0_15, %c0_16] : memref<16x32xbf16, #tpu.memory_space<vmem>>, vector<16x32xbf16>
    tpu.vector_store %arg7[%c0_15, %c0_16], %29 {strides = array<i32>} : memref<16x32xbf16, #tpu.memory_space<vmem>>, vector<16x32xbf16>,
    return
  }
  func.func @transform_0(%arg0: i32) -> (i32, i32) {
    %c0_i32 = arith.constant 0 : i32
    %c0_i32_0 = arith.constant 0 : i32
    return %arg0, %c0_i32 : i32, i32
  }
  func.func @transform_1(%arg0: i32) -> (i32, i32) {
    %c0_i32 = arith.constant 0 : i32
    %c0_i32_0 = arith.constant 0 : i32
    %c0_i32_1 = arith.constant 0 : i32
    return %c0_i32, %c0_i32_0 : i32, i32
  }
  func.func @transform_2(%arg0: i32) -> (i32, i32) {
    %c0_i32 = arith.constant 0 : i32
    %c0_i32_0 = arith.constant 0 : i32
    %c0_i32_1 = arith.constant 0 : i32
    return %c0_i32, %c0_i32_0 : i32, i32
  }
  func.func @transform_3(%arg0: i32) -> (i32, i32) {
    %c0_i32 = arith.constant 0 : i32
    %c0_i32_0 = arith.constant 0 : i32
    %c0_i32_1 = arith.constant 0 : i32
    return %c0_i32, %c0_i32_0 : i32, i32
  }
  func.func @transform_4(%arg0: i32) -> (i32, i32) {
    %c0_i32 = arith.constant 0 : i32
    %c0_i32_0 = arith.constant 0 : i32
    return %arg0, %c0_i32 : i32, i32
  }
  func.func @transform_5(%arg0: i32) -> (i32, i32) {
    %c0_i32 = arith.constant 0 : i32
    %c0_i32_0 = arith.constant 0 : i32
    return %arg0, %c0_i32 : i32, i32
  }
  func.func @transform_6(%arg0: i32) -> (i32, i32) {
    %c0_i32 = arith.constant 0 : i32
    %c0_i32_0 = arith.constant 0 : i32
    return %arg0, %c0_i32 : i32, i32
  }
}

</mosaic_0001>

<bundles_post_ra>
// kernel: slopgpt_transformer_block.4
= control target key start
LH: loop header
LB: loop body
LE: loop exit
PB: predicated region body
PF: predicated region fallthrough
CT: control target
= control target key end

     0   :  { %s1680_s0 = inlined_call_operand.hbm [shape: s32[8,8], index: 0, kind: input, shape index: {}]   ;;  %s1681_s1 = inlined_call_operand.hbm [shape: bf16[2,8,32], index: 1, kind: input, shape index: {}]   ;;  %s1682_s2 = inlined_call_operand.hbm [shape: bf16[2,8,32], index: 2, kind: input, shape index: {}]   ;;  %s1683_s3 = inlined_call_operand.hbm [shape: bf16[2,8,32], index: 3, kind: input, shape index: {}]   ;;  %s1684_s4 = inlined_call_operand.hbm [shape: bf16[2,8,32], index: 4, kind: output, shape index: {}]  }
   0x1   :  { %1698 = sst [smem:[#allocation17_spill]] %s1681_s1 }
   0x2   :  { %1699 = sst [smem:[#allocation18_spill]] %s1682_s2 }
   0x3   :  { %9 = vsyncpa [#allocation3], 0 }
   0x4   :  { %10 = vsyncpa [#allocation6], 0 }
   0x5   :  { %12 = vsyncpa [#allocation6 + $0x1], 0 }
   0x6   :  { %13 = vsyncpa [#allocation9], 0 }
   0x7   :  { %15 = vsyncpa [#allocation9 + $0x1], 0 }
   0x8   :  { %16 = vsyncpa [#allocation4], 0 }
   0x9   :  { %18 = vsyncpa [#allocation4 + $0x1], 0  ;;  %s1329_s15 = smov 0   ;;  %s1331_s16 = smov 0  }
   0xa   :  { %s1333_s17 = smov 0   ;;  %s1335_s18 = smov 0  }
   0xb LB: > { %s1350_s19 = sadd.s32 1, %s1289_s18   ;;  %s52_s20 = sadd.s32 1, %s1285_s17  ;;  %s1289_s18 = sphi %s1335_s18, %s1724_s18   ;;  %s1285_s17 = sphi %s1333_s17, %s1728_s17   ;;  %s1281_s16 = sphi %s1331_s16, %s1727_s16   ;;  %s1277_s15 = sphi %s1329_s15, %s1726_s15  }
   0xc   : > { %1700 = sst [smem:[#allocation15_spill]] %s1350_s19  ;;  %s49_s21 = ssub.s32 %s1289_s18, %s1350_s19 }
   0xd   : > { %p1685_p0 = scmp.ne.s32.totalorder %s1285_s17, %s1281_s16  ;;  %p50_p1 = scmp.eq.s32.totalorder %s49_s21, 0 }
   0xe   : > { %p60_p2 = scmp.eq.s32.totalorder %s1289_s18, 0  ;;  %p1034_p4 = scmp.lt.s32.totalorder %s1289_s18, 2 }
   0xf   : > { %s1361_s22 = scalar_select %p50_p1, %s1285_s17, %s52_s20  }
  0x10   : > { %p61_p5 = por %p60_p2, %p1685_p0  ;;  %s178_s23 = sand.u32 1, %s1289_s18  }
  0x11   : > { %1701 = sst [smem:[#allocation16_spill]] %s1361_s22  ;;  %s1686_s24 = sand.u32 1, %s1285_s17  }
  0x12   : > { %s1370_s25 = sshll.u32 %s1686_s24, 2  ;;  %s1373_s26 = sshll.u32 %s1289_s18, 6 }
  0x13   : > { %s1702_s1 = sld [smem:[#allocation17_spill]]  ;;  %s182_s30 = scalar_lea.vmem [#allocation5], %s1370_s25 }
  0x14   : > { %s189_s5 = sshll.u32 %s182_s30, 4  ;;  %p1382_p6 = pnand %p1034_p4, %p61_p5  ;;  %s1386_s5 = int_to_ptr.vmem [resolvable:$true] %s189_s5 }
  0x15   : > { %s1388_s7 = scalar_lea.sflag [#allocation6], %s178_s23 }
  0x16   : > { %s1703_s6 = scalar_select %p1382_p6, 1, 0 }
  0x17   : > { %p1394_p8 = pneg %p1382_p6 }
  0x19   : > { %s1379_s29 = scalar_lea.hbm %s1702_s1, %s1373_s26  ;;  %s1102_s12 = scalar_lea.hbm %s1702_s1, 128 }
  0x1a   : > { %s1097_s8 = scalar_lea.hbm %s1379_s29, 64  ;;  %p1103_p11 = scmp.lt.u32.totalorder %s1379_s29, %s1702_s1 }
  0x1b   : > { %p1098_p7 = scmp.ne.s32.totalorder %s1379_s29, %s1097_s8  ;;  %p1104_p12 = scmp.lt.u32.totalorder %s1102_s12, %s1097_s8 }
  0x1c   : > { %s1704_s9 = scalar_select %p1394_p8, 1, 0 }
  0x1d   : > { %p1100_p9 = pnand %p1394_p8, %p1098_p7  ;;  %p1105_p13 = por %p1104_p12, %p1103_p11 }
  0x1e   : > { %p1106_p1 = scmp.lt.u32.totalorder %s1097_s8, %s1379_s29 }
  0x1f   : > { %p1101_p10 = pneg %p1100_p9 }
  0x20   : > { %p1107_p2 = por %p1106_p1, %p1105_p13 }
  0x22   : > { %p1108_p4 = pnand %p1107_p2, %p1101_p10 }
  0x24   : > { %1111 = shalt.err (!%p1108_p4)
}
  0x25   : > { %s1112_s20 = scalar_lea.vmem %s1386_s5, 64  ;;  %s1291_s21 = smov [#allocation5]  }
  0x26   : > { %p1113_p5 = scmp.ne.s32.totalorder %s1386_s5, %s1112_s20  ;;  %s1117_s23 = sshll.u32 %s1291_s21, 4  ;;  %s1118_s23 = int_to_ptr.vmem [resolvable:$false] %s1117_s23 }
  0x27   : > { %s1119_s27 = scalar_lea.vmem %s1118_s23, 128  ;;  %p1120_p3 = scmp.lt.s32.totalorder %s1386_s5, %s1118_s23 }
  0x28   : > { %p1115_p7 = pnand %p1113_p5, %p1394_p8  ;;  %p1121_p0 = scmp.lt.s32.totalorder %s1119_s27, %s1112_s20 }
  0x2a   : > { %p1116_p9 = pneg %p1115_p7  ;;  %p1122_p11 = por %p1121_p0, %p1120_p3 }
  0x2c   : > { %p1123_p12 = pnand %p1122_p11, %p1116_p9 }
  0x2e   : > { %1126 = shalt.err (!%p1123_p12)
}
  0x2f   : > { %1022 = dma.hbm_to_vmem [thread:$0]  (!%p1382_p6), %s1379_s29, 64, %s1386_s5, %s1388_s7  }
  0x30   : > { %s1419_s28 = sadd.s32 4294967295, %s1289_s18   ;;  %s908_s30 = sadd.s32 4294967294, %s1289_s18  }
  0x31   : > { %p65_p0 = scmp.ne.s32.totalorder %s1281_s16, %s1277_s15  ;;  %p1688_p3 = scmp.eq.s32.totalorder %s1419_s28, 0 }
  0x32   : > { %p141_p10 = scmp.eq.s32.totalorder %s1419_s28, 1  ;;  %p147_p13 = scmp.eq.s32.totalorder %s908_s30, 1 }
  0x33   : > { %p1428_p1 = por %p1688_p3, %p65_p0  ;;  %p909_p2 = scmp.ge.s32.totalorder %s1289_s18, 1 }
  0x34   : > { %p1706_p4 = scmp.ne.s32.totalorder %s1285_s17, %s1281_s16  ;;  %p1440_p7 = por %p147_p13, %p65_p0 }
  0x35   : > { %s1705_s8 = scalar_select %p1428_p1, 1, 0 }
  0x36   : > { %p1436_p5 = por %p141_p10, %p1706_p4  ;;  %p154_p9 = scmp.lt.s32.totalorder %s1289_s18, 3 }
  0x37   : > { %s1708_s5 = scalar_select %p1440_p7, 1, 0 }
  0x38   : > { %s1707_s29 = scalar_select %p1436_p5, 1, 0 }
  0x39   : > { %p1445_p11 = pnand %p909_p2, %p154_p9  ;;  %s1292_s11 = smov [#allocation2]  }
  0x3a   : > { %s167_s12 = sshll.u32 %s1292_s11, 4  ;;  %s1710_s2 = sld [smem:[#allocation18_spill]]  ;;  %s1449_s12 = int_to_ptr.vmem [resolvable:$true] %s167_s12 }
  0x3b   : > { %s1709_s10 = scalar_select %p1445_p11, 1, 0 }
  0x3c   : > { %p1015_p12 = pneg %p1445_p11  ;;  %s200_s21 = scalar_lea.vmem [#allocation7], %s1370_s25 }
  0x3d   : > { %s207_s23 = sshll.u32 %s200_s21, 4  ;;  %s208_s23 = int_to_ptr.vmem [resolvable:$true] %s207_s23 }
  0x3e   : > { %p1462_p0 = pnand %p1015_p12, %p1688_p3 }
  0x40   : > { %s1455_s20 = scalar_lea.hbm %s1710_s2, %s1373_s26  ;;  %s1132_s14 = scalar_lea.hbm %s1710_s2, 128 }
  0x41   : > { %s1711_s27 = scalar_select %p1462_p0, 1, 0 }
  0x42   : > { %s1127_s30 = scalar_lea.hbm %s1455_s20, 64  ;;  %p1133_p4 = scmp.lt.u32.totalorder %s1455_s20, %s1710_s2 }
  0x43   : > { %p1128_p10 = scmp.ne.s32.totalorder %s1455_s20, %s1127_s30  ;;  %p1134_p9 = scmp.lt.u32.totalorder %s1132_s14, %s1127_s30 }
  0x44   : > { %p1136_p5 = scmp.lt.u32.totalorder %s1127_s30, %s1455_s20 }
  0x45   : > { %p1130_p13 = pnand %p1128_p10, %p1394_p8  ;;  %p1135_p7 = por %p1134_p9, %p1133_p4 }
  0x47   : > { %p1131_p2 = pneg %p1130_p13  ;;  %p1137_p12 = por %p1136_p5, %p1135_p7 }
  0x49   : > { %p1138_p3 = pnand %p1137_p12, %p1131_p2 }
  0x4b   : > { %1141 = shalt.err (!%p1138_p3)
}
  0x4c   : > { %s1142_s21 = scalar_lea.vmem %s208_s23, 64  ;;  %s1293_s22 = smov [#allocation7]  }
  0x4d   : > { %p1143_p1 = scmp.ne.s32.totalorder %s208_s23, %s1142_s21  ;;  %s1147_s19 = sshll.u32 %s1293_s22, 4  ;;  %s1148_s19 = int_to_ptr.vmem [resolvable:$false] %s1147_s19 }
  0x4e   : > { %s1149_s11 = scalar_lea.vmem %s1148_s19, 128  ;;  %p1150_p11 = scmp.lt.s32.totalorder %s208_s23, %s1148_s19 }
  0x4f   : > { %p1145_p10 = pnand %p1143_p1, %p1394_p8  ;;  %p1151_p0 = scmp.lt.s32.totalorder %s1149_s11, %s1142_s21 }
  0x51   : > { %p1146_p13 = pneg %p1145_p10  ;;  %p1152_p6 = por %p1151_p0, %p1150_p11 }
  0x53   : > { %p1153_p4 = pnand %p1152_p6, %p1146_p13 }
  0x55   : > { %1156 = shalt.err (!%p1153_p4)
}
  0x56   : > { %p1712_p9 = scmp.ne.s32.totalorder %s1703_s6, 0  ;;  %s1488_s30 = scalar_lea.hbm %s1683_s3, %s1373_s26 }
  0x57   : > { %s1157_s19 = scalar_lea.hbm %s1680_s0, 128  ;;  %p1713_p3 = scmp.ne.s32.totalorder %s1711_s27, 0 }
  0x58   : > { %1025 = dma.hbm_to_vmem [thread:$0]  (!%p1712_p9), %s1455_s20, 64, %s208_s23, %s1388_s7  }
  0x59   : > { %p1158_p6 = scmp.ne.s32.totalorder %s1680_s0, %s1157_s19  ;;  %p1159_p1 = pneg %p1713_p3 }
  0x5a   : > { %p1164_p11 = scmp.lt.u32.totalorder %s1157_s19, %s1680_s0 }
  0x5b   : > { %p1160_p5 = pnand %p1159_p1, %p1158_p6 }
  0x5d   : > { %p1161_p7 = pneg %p1160_p5 }
  0x5f   : > { %p1166_p0 = pnand %p1164_p11, %p1161_p7 }
  0x61   : > { %1169 = shalt.err (!%p1166_p0)
}
  0x62   : > { %s1170_s26 = scalar_lea.vmem %s1449_s12, 128  ;;  %p1178_p13 = scmp.lt.s32.totalorder %s1449_s12, %s1449_s12 }
  0x63   : > { %p1171_p2 = scmp.ne.s32.totalorder %s1449_s12, %s1170_s26  ;;  %p1179_p4 = scmp.lt.s32.totalorder %s1170_s26, %s1170_s26 }
  0x65   : > { %p1173_p12 = pnand %p1171_p2, %p1159_p1  ;;  %p1180_p9 = por %p1179_p4, %p1178_p13 }
  0x67   : > { %p1174_p10 = pneg %p1173_p12 }
  0x69   : > { %p1181_p8 = pnand %p1180_p9, %p1174_p10 }
  0x6b   : > { %1184 = shalt.err (!%p1181_p8)
}
  0x6c   : > { %1018 = dma.hbm_to_vmem [thread:$0]  (!%p1713_p3), %s1680_s0, 128, %s1449_s12, [#allocation3]  }
  0x6d   : > { %s218_s20 = scalar_lea.vmem [#allocation8], %s1370_s25  ;;  %s1714_s1 = sand.u32 1, %s1285_s17  }
  0x6e   : > { %s225_s23 = sshll.u32 %s218_s20, 4  ;;  %s215_s24 = scalar_lea.sflag [#allocation9], %s1714_s1  ;;  %s226_s23 = int_to_ptr.vmem [resolvable:$true] %s225_s23 }
  0x6f   : > { %s1185_s22 = scalar_lea.hbm %s1488_s30, 64  ;;  %p1715_p9 = scmp.ne.s32.totalorder %s1704_s9, 0 }
  0x70   : > { %p1186_p8 = scmp.ne.s32.totalorder %s1488_s30, %s1185_s22  ;;  %s1190_s19 = scalar_lea.hbm %s1683_s3, 128 }
  0x71   : > { %p1191_p5 = scmp.lt.u32.totalorder %s1488_s30, %s1683_s3  ;;  %p1192_p7 = scmp.lt.u32.totalorder %s1190_s19, %s1185_s22 }
  0x72   : > { %p1188_p6 = pnand %p1186_p8, %p1715_p9  ;;  %p1194_p11 = scmp.lt.u32.totalorder %s1185_s22, %s1488_s30 }
  0x73   : > { %p1193_p3 = por %p1192_p7, %p1191_p5 }
  0x74   : > { %p1189_p1 = pneg %p1188_p6 }
  0x75   : > { %p1195_p0 = por %p1194_p11, %p1193_p3 }
  0x77   : > { %p1196_p2 = pnand %p1195_p0, %p1189_p1 }
  0x79   : > { %1199 = shalt.err (!%p1196_p2)
}
  0x7a   : > { %s1200_s25 = scalar_lea.vmem %s226_s23, 64  ;;  %s1294_s12 = smov [#allocation8]  }
  0x7b   : > { %p1201_p12 = scmp.ne.s32.totalorder %s226_s23, %s1200_s25  ;;  %s1205_s11 = sshll.u32 %s1294_s12, 4  ;;  %s1206_s11 = int_to_ptr.vmem [resolvable:$false] %s1205_s11 }
  0x7c   : > { %s1207_s26 = scalar_lea.vmem %s1206_s11, 128  ;;  %p1208_p4 = scmp.lt.s32.totalorder %s226_s23, %s1206_s11 }
  0x7d   : > { %p1203_p10 = pnand %p1201_p12, %p1715_p9  ;;  %p1209_p8 = scmp.lt.s32.totalorder %s1207_s26, %s1200_s25 }
  0x7f   : > { %p1204_p13 = pneg %p1203_p10  ;;  %p1210_p6 = por %p1209_p8, %p1208_p4 }
  0x81   : > { %p1211_p5 = pnand %p1210_p6, %p1204_p13 }
  0x83   : > { %1214 = shalt.err (!%p1211_p5)
}
  0x84   : > { %p1716_p7 = scmp.ne.s32.totalorder %s1703_s6, 0  ;;  %p1717_p1 = scmp.ne.s32.totalorder %s1709_s10, 0 }
  0x85   : > { %p1718_p3 = scmp.eq.s32.totalorder (!%p1717_p1), %s1419_s28, 0 }
  0x86   : > { %1028 = dma.hbm_to_vmem [thread:$0]  (!%p1716_p7), %s1488_s30, 64, %s226_s23, %s215_s24  }
  0x87   : > { %234 = sbr.rel (%p1717_p1) target bundleno = 1316 (0x524), region = 36 }
  0x8e   : > { %1260 = dma.done.wait (%p1718_p3), [#allocation3], 128   ;;  %p1719_p9 = pmov %p1718_p3 }
  0x8f   : > { %s240_s9 = sand.u32 1, %s1419_s28   ;;  %s1539_s2 = sand.u32 1, %s1281_s16  }
  0x90   : > { %1262 = vsyncadd (%p1719_p9), [#allocation3], 4294967168  ;;  %s1542_s7 = sshll.u32 %s1539_s2, 2  ;;  %s241_s6 = scalar_lea.sflag [#allocation6], %s240_s9 }
  0x91   : > { %s244_s30 = scalar_lea.vmem [#allocation5], %s1542_s7  ;;  %p1720_p11 = scmp.ne.s32.totalorder %s1705_s8, 0 }
  0x93   : > { %1264 = dma.done.wait (%p1720_p11), %s241_s6, 128  }
  0x94   : > { %1266 = vsyncadd (%p1720_p11), %s241_s6, 4294967168  ;;  %s253_s10 = scalar_lea.vmem [#allocation7], %s1542_s7  ;;  %s259_s20 = scalar_lea.sflag [#allocation9], %s1539_s2 }
  0x95   : > { %s262_s23 = scalar_lea.vmem [#allocation8], %s1542_s7 }
  0x96   : > { %1268 = dma.done.wait (%p1720_p11), %s259_s20, 64  }
  0x97   : > { %1270 = vsyncadd (%p1720_p11), %s259_s20, 4294967232  ;;  %v1295_v0 = vmov 0.0   ;;  %vm1296_vm0 = vmmov 0   ;;  %vm304_vm1 = vcmask 64512   ;;  %v299_v1 = vld [vmem:[%s253_s10] sm:$0xf] }
  0x98   : > { %955 = vmatprep.subr.bf16.mxu0 %v1295_v0  ;;  %957 = vmatprep.mubr.msk.bf16.mxu0 %vm1296_vm0, %v1295_v0  ;;  %v309_v2 = vsel %vm304_vm1, %v299_v1, 0  ;;  %v298_v3 = vld [vmem:[%s244_s30] sm:$0xf]  ;;  %s1297_s8 = smov 120   ;;  %v927_v5 = vcombine.low %v299_v1, %v299_v1  ;;  %s1298_s1 = smov 112   ;;  %v301_v6 = vld [vmem:[#allocation2] sm:$0xff] }
  0x99   : > { %961 = vmatprep.subr.bf16.mxu1 %v1295_v0  ;;  %963 = vmatprep.mubr.msk.bf16.mxu1 %vm1296_vm0, %v1295_v0  ;;  %v926_v4 = vcombine.low %v298_v3, %v298_v3  ;;  %s1299_s24 = smov 104   ;;  %vm302_vm2 = vcmp.eq.s32.totalorder %v301_v6, 0  ;;  %v300_v14 = vld [vmem:[%s262_s23] sm:$0xf]  ;;  %vm364_vm3 = vcmask 1043456   ;;  %s1300_s22 = smov 8  }
  0x9a   : > { %956 = vmatpush3.bf16.xpose.msra.mxu0 %v309_v2  ;;  %v1573_v7 = vsel %vm302_vm2, -1e+30, %v1295_v0  ;;  %v366_v15 = vsel %vm364_vm3, %v300_v14, 0  ;;  %v929_v47 = vcombine.low %v300_v14, %v300_v14  ;;  %s1301_s27 = smov 16   ;;  %s1302_s13 = smov 24   ;;  %vm762_vm4 = vcmask 130048  }
  0x9b   : > { %973 = vmatprep.subr.bf16.mxu0 %v1295_v0  ;;  %413 = vrot.lane.b32.xlu1 %v926_v4, %s1297_s8  ;;  %vm764_vm5 = vcmask 195584   ;;  %s936_s19 = sshll.u32 %s1419_s28, 6  ;;  %s296_s14 = scalar_lea.vmem [#allocation10], %s1542_s7  ;;  %vm767_vm6 = vcmask 257024  }
  0x9c   : > { %962 = vmatpush3.bf16.msra.mxu1 %v366_v15  ;;  %s783_s21 = sshll.u32 %s296_s14, 4  ;;  %s1636_s11 = scalar_lea.hbm %s1684_s4, %s936_s19  ;;  %s1638_s21 = int_to_ptr.vmem [resolvable:$true] %s783_s21 }
  0x9d   : > { %967 = vmatprep.subr.bf16.mxu1 %v1295_v0  ;;  %s770_s26 = scalar_lea.sflag [#allocation4], %s1539_s2  ;;  %s1215_s28 = scalar_lea.vmem %s1638_s21, 64 }
  0x9e   : > { %p1216_p0 = scmp.ne.s32.totalorder %s1638_s21, %s1215_s28  ;;  %p1721_p2 = scmp.ne.s32.totalorder %s1707_s29, 0 }
  0x9f   : > { %531 = vrot.lane.b32.xlu1 %v927_v5, %s1298_s1  ;;  %s1303_s9 = smov [#allocation10]  }
  0xa0   : > { %p1217_p12 = pnand %p1216_p0, %p1721_p2  ;;  %s1219_s7 = sshll.u32 %s1303_s9, 4  ;;  %s1220_s7 = int_to_ptr.vmem [resolvable:$false] %s1219_s7 }
  0xa1   : > { %958 = vmatmul.mubr.msk.bf16.vlgmr.msra.gmra.mrb[0].mxu0 %vm304_vm1, %v298_v3  ;;  %s1221_s6 = scalar_lea.vmem %s1220_s7, 128  ;;  %p1222_p13 = scmp.lt.s32.totalorder %s1638_s21, %s1220_s7 }
  0xa2   : > { %975 = vmatprep.mubr.msk.bf16.mxu0 %vm1296_vm0, %v1295_v0  ;;  %p1218_p10 = pneg %p1217_p12  ;;  %p1223_p4 = scmp.lt.s32.totalorder %s1221_s6, %s1215_s28 }
  0xa3   : > { %529 = vrot.lane.b32.xlu1 %v926_v4, %s1298_s1 }
  0xa4   : > { %p1224_p8 = por %p1223_p4, %p1222_p13 }
  0xa6   : > { %p1225_p6 = pnand %p1224_p8, %p1218_p10 }
  0xa7   : > { %641 = vrot.lane.b32.xlu1 %v927_v5, %s1299_s24 }
  0xab   : > { %639 = vrot.lane.b32.xlu1 %v926_v4, %s1299_s24 }
 0x10d   : > { %v414_v21 = vpop.permute.xlu1 %413 }
 0x111   : > { %v532_v24 = vpop.permute.xlu1 %531 }
 0x112   : > { %v537_v25 = vsel %vm304_vm1, %v532_v24, 0 }
 0x115   : > { %v530_v26 = vpop.permute.xlu1 %529 }
 0x119   : > { %v642_v27 = vpop.permute.xlu1 %641 }
 0x11a   : > { %v647_v28 = vsel %vm304_vm1, %v642_v27, 0 }
 0x11d   : > { %v640_v29 = vpop.permute.xlu1 %639 }
 0x174   : > { %v345_v8 = vpop.f32.mrb[0].mxu0 }
 0x175   : > { %v346_v9 = vadd.f32 %v345_v8, %v1573_v7  ;;  %v959_v10 = vpop.f32.mrb[1].mxu0 }
 0x176   : > { %v348_v11 = vpop.f32.mrb[2].mxu0 }
 0x177   : > { %v960_v12 = vpop.f32.mrb[3].mxu0  ;;  %v351_v13 = vsel %vm304_vm1, %v346_v9, -inf }
 0x178   : > { %352 = vmax.xlane.f32.xlu0 %v351_v13 }
 0x18e   : > { %418 = vrot.lane.b32.xlu0 %v927_v5, %s1297_s8 }
 0x205   : > { %v353_v16 = vpop.xlane.xlu0 %352 }
 0x206   : > { %v354_v17 = vsub.f32 %v346_v9, %v353_v16 }
 0x208   : > { %v355_v18 = vmul.f32 1.442695, %v354_v17 }
 0x209   : > { %v419_v19 = vpop.permute.xlu0 %418 }
 0x20a   : > { %1081 = vpow2.f32 %v355_v18  ;;  %v424_v22 = vsel %vm304_vm1, %v419_v19, 0 }
 0x214   : > { %v1582_v20 = vpop.eup %1081 }
 0x215   : > { %v360_v23 = vpack.c.bf16 %v1582_v20, %v1582_v20  ;;  %v357_v14 = vsel %vm304_vm1, %v1582_v20, 0.0 }
 0x217   : > { %964 = vmatmul.mubr.msk.bf16.vlgmr.msra.gmra.mrb[0].mxu1 %vm304_vm1, %v360_v23 }
 0x218   : > { %968 = vmatpush3.bf16.xpose.msra.mxu1 %v424_v22  ;;  %969 = vmatprep.mubr.msk.bf16.mxu1 %vm1296_vm0, %v1295_v0 }
 0x219   : > { %979 = vmatprep.subr.bf16.mxu1 %v1295_v0 }
 0x21f   : > { %970 = vmatmul.mubr.msk.bf16.vlgmr.msra.gmra.mrb[4].mxu1 %vm304_vm1, %v414_v21 }
 0x220   : > { %980 = vmatpush3.bf16.xpose.msra.mxu1 %v537_v25  ;;  %981 = vmatprep.mubr.msk.bf16.mxu1 %vm1296_vm0, %v1295_v0 }
 0x221   : > { %991 = vmatprep.subr.bf16.mxu1 %v1295_v0 }
 0x227   : > { %982 = vmatmul.mubr.msk.bf16.vlgmr.msra.gmra.mrb[8].mxu1 %vm304_vm1, %v530_v26 }
 0x228   : > { %992 = vmatpush3.bf16.xpose.msra.mxu1 %v647_v28  ;;  %993 = vmatprep.mubr.msk.bf16.mxu1 %vm1296_vm0, %v1295_v0 }
 0x22f   : > { %994 = vmatmul.mubr.msk.bf16.vlgmr.msra.gmra.mrb[12].mxu1 %vm304_vm1, %v640_v29 }
 0x2ea   : > { %v1601_v30 = vpop.f32.mrb[0].mxu1 }
 0x2eb   : > { %v965_v31 = vpop.f32.mrb[1].mxu1 }
 0x2ec   : > { %v405_v32 = vpop.f32.mrb[2].mxu1 }
 0x2ed   : > { %v966_v33 = vpop.f32.mrb[3].mxu1 }
 0x2f2   : > { %v460_v34 = vpop.f32.mrb[4].mxu1 }
 0x2f3   : > { %v461_v35 = vadd.f32 %v460_v34, %v1573_v7  ;;  %v971_v36 = vpop.f32.mrb[5].mxu1 }
 0x2f4   : > { %v463_v37 = vpop.f32.mrb[6].mxu1 }
 0x2f5   : > { %v972_v38 = vpop.f32.mrb[7].mxu1  ;;  %v466_v39 = vsel %vm304_vm1, %v461_v35, -inf }
 0x2f6   : > { %467 = vmax.xlane.f32.xlu1 %v466_v39 }
 0x2fa   : > { %v573_v40 = vpop.f32.mrb[8].mxu1 }
 0x2fb   : > { %v574_v41 = vadd.f32 %v573_v40, %v1573_v7  ;;  %v983_v42 = vpop.f32.mrb[9].mxu1 }
 0x2fc   : > { %v576_v43 = vpop.f32.mrb[10].mxu1 }
 0x2fd   : > { %v579_v44 = vsel %vm304_vm1, %v574_v41, -inf  ;;  %v984_v45 = vpop.f32.mrb[11].mxu1 }
 0x2fe   : > { %580 = vmax.xlane.f32.xlu0 %v579_v44 }
 0x302   : > { %v683_v46 = vpop.f32.mrb[12].mxu1 }
 0x303   : > { %v995_v48 = vpop.f32.mrb[13].mxu1  ;;  %v684_v51 = vadd.f32 %v683_v46, %v1573_v7 }
 0x304   : > { %v686_v49 = vpop.f32.mrb[14].mxu1 }
 0x305   : > { %v996_v50 = vpop.f32.mrb[15].mxu1  ;;  %v689_v52 = vsel %vm304_vm1, %v684_v51, -inf }
 0x307   : > { %589 = vrot.lane.b32.xlu1 %v929_v47, %s1298_s1 }
 0x314   : > { %479 = vrot.lane.b32.xlu0 %v929_v47, %s1297_s8 }
 0x32b   : > { %690 = vmax.xlane.f32.xlu1 %v689_v52 }
 0x33c   : > { %699 = vrot.lane.b32.xlu1 %v929_v47, %s1299_s24 }
 0x383   : > { %v468_v53 = vpop.xlane.xlu1 %467 }
 0x384   : > { %v469_v54 = vsub.f32 %v461_v35, %v468_v53 }
 0x386   : > { %v470_v55 = vmul.f32 1.442695, %v469_v54 }
 0x387   : > { %v590_v62 = vpop.permute.xlu1 %589 }
 0x388   : > { %1083 = vpow2.f32 %v470_v55  ;;  %v595_v2 = vsel %vm364_vm3, %v590_v62, 0 }
 0x38b   : > { %v581_v56 = vpop.xlane.xlu0 %580 }
 0x38c   : > { %v582_v57 = vsub.f32 %v574_v41, %v581_v56 }
 0x38e   : > { %v583_v58 = vmul.f32 1.442695, %v582_v57 }
 0x38f   : > { %v480_v59 = vpop.permute.xlu0 %479 }
 0x390   : > { %1085 = vpow2.f32 %v583_v58  ;;  %v485_v60 = vsel %vm364_vm3, %v480_v59, 0 }
 0x391   : > { %974 = vmatpush3.bf16.msra.mxu0 %v485_v60 }
 0x392   : > { %v1084_v61 = vpop.eup %1083  ;;  %985 = vmatprep.subr.bf16.mxu0 %v1295_v0 }
 0x393   : > { %v472_v63 = vsel %vm304_vm1, %v1084_v61, 0.0  ;;  %v475_v1 = vpack.c.bf16 %v1084_v61, %v1084_v61 }
 0x394   : > { %473 = vadd.xlane.f32.xlu0 %v472_v63 }
 0x395   : > { %976 = vmatmul.mubr.msk.bf16.vlgmr.msra.gmra.mrb[4].mxu0 %vm304_vm1, %v475_v1 }
 0x396   : > { %986 = vmatpush3.bf16.msra.mxu0 %v595_v2  ;;  %987 = vmatprep.mubr.msk.bf16.mxu0 %vm1296_vm0, %v1295_v0 }
 0x397   : > { %997 = vmatprep.subr.bf16.mxu0 %v1295_v0 }
 0x39a   : > { %v1086_v3 = vpop.eup %1085 }
 0x39b   : > { %v585_v4 = vsel %vm304_vm1, %v1086_v3, 0.0  ;;  %v588_v5 = vpack.c.bf16 %v1086_v3, %v1086_v3 }
 0x39c   : > { %586 = vadd.xlane.f32.xlu1 %v585_v4 }
 0x39d   : > { %988 = vmatmul.mubr.msk.bf16.vlgmr.msra.gmra.mrb[8].mxu0 %vm304_vm1, %v588_v5 }
 0x39e   : > { %999 = vmatprep.mubr.msk.bf16.mxu0 %vm1296_vm0, %v1295_v0 }
 0x3b8   : > { %v691_v6 = vpop.xlane.xlu1 %690 }
 0x3b9   : > { %v692_v7 = vsub.f32 %v684_v51, %v691_v6 }
 0x3bb   : > { %v693_v8 = vmul.f32 1.442695, %v692_v7 }
 0x3bc   : > { %v700_v9 = vpop.permute.xlu1 %699 }
 0x3bd   : > { %1087 = vpow2.f32 %v693_v8  ;;  %v705_v10 = vsel %vm364_vm3, %v700_v9, 0 }
 0x3be   : > { %998 = vmatpush3.bf16.msra.mxu0 %v705_v10 }
 0x3c7   : > { %v1088_v11 = vpop.eup %1087 }
 0x3c8   : > { %v695_v12 = vsel %vm304_vm1, %v1088_v11, 0.0  ;;  %v698_v13 = vpack.c.bf16 %v1088_v11, %v1088_v11 }
 0x3c9   : > { %696 = vadd.xlane.f32.xlu0 %v695_v12 }
 0x3ca   : > { %1000 = vmatmul.mubr.msk.bf16.vlgmr.msra.gmra.mrb[12].mxu0 %vm304_vm1, %v698_v13 }
 0x3cd   : > { %358 = vadd.xlane.f32.xlu0 %v357_v14 }
 0x421   : > { %v474_v0 = vpop.xlane.xlu0 %473 }
 0x422   : > { %1089 = vrcp.f32 %v474_v0 }
 0x429   : > { %v587_v15 = vpop.xlane.xlu1 %586 }
 0x42a   : > { %1091 = vrcp.f32 %v587_v15 }
 0x42c   : > { %v1090_v16 = vpop.eup %1089 }
 0x434   : > { %v1092_v23 = vpop.eup %1091 }
 0x456   : > { %v697_v28 = vpop.xlane.xlu0 %696 }
 0x457   : > { %1093 = vrcp.f32 %v697_v28 }
 0x45a   : > { %v359_v36 = vpop.xlane.xlu0 %358 }
 0x45b   : > { %1095 = vrcp.f32 %v359_v36 }
 0x461   : > { %v1094_v29 = vpop.eup %1093 }
 0x465   : > { %v1096_v37 = vpop.eup %1095 }
 0x466   : > { %v409_v39 = vmul.f32 %v1096_v37, %v1601_v30 }
 0x468   : > { %v521_v17 = vpop.f32.mrb[4].mxu0 }
 0x469   : > { %v528_v18 = vmul.f32 %v1090_v16, %v521_v17  ;;  %v977_v19 = vpop.f32.mrb[5].mxu0 }
 0x46a   : > { %v524_v21 = vpop.f32.mrb[6].mxu0 }
 0x46b   : > { %750 = vrot.lane.b32.xlu1 %v528_v18, %s1300_s22  ;;  %v978_v22 = vpop.f32.mrb[7].mxu0 }
 0x470   : > { %v631_v24 = vpop.f32.mrb[8].mxu0 }
 0x471   : > { %v638_v25 = vmul.f32 %v1092_v23, %v631_v24  ;;  %v989_v26 = vpop.f32.mrb[9].mxu0 }
 0x472   : > { %v634_v27 = vpop.f32.mrb[10].mxu0 }
 0x473   : > { %754 = vrot.lane.b32.xlu0 %v638_v25, %s1301_s27  ;;  %v990_v20 = vpop.f32.mrb[11].mxu0 }
 0x49d   : > { %v741_v31 = vpop.f32.mrb[12].mxu0 }
 0x49e   : > { %v748_v32 = vmul.f32 %v1094_v29, %v741_v31  ;;  %v1001_v33 = vpop.f32.mrb[13].mxu0 }
 0x49f   : > { %v744_v34 = vpop.f32.mrb[14].mxu0 }
 0x4a0   : > { %758 = vrot.lane.b32.xlu1 %v748_v32, %s1302_s13  ;;  %v1002_v35 = vpop.f32.mrb[15].mxu0 }
 0x4dd   : > { %v751_v38 = vpop.permute.xlu1 %750 }
 0x4de   : > { %v761_v41 = vsel %vm304_vm1, %v409_v39, %v751_v38 }
 0x4e5   : > { %v755_v40 = vpop.permute.xlu0 %754 }
 0x4e6   : > { %v763_v42 = vsel %vm762_vm4, %v761_v41, %v755_v40 }
 0x512   : > { %v759_v43 = vpop.permute.xlu1 %758 }
 0x513   : > { %v765_v44 = vsel %vm764_vm5, %v763_v42, %v759_v43 }
 0x514   : > { %v766_v45 = vpack.c.bf16 %v765_v44, %v765_v44 }
 0x516   : > { %768 = vst.msk [vmem:[%s296_s14] sm:$0xf] %vm767_vm6, %v766_v45 }
 0x517   : > { %1228 = shalt.err (!%p1225_p6)
}
 0x518   : > { %s1229_s2 = scalar_lea.hbm %s1636_s11, 64  ;;  %s1233_s20 = scalar_lea.hbm %s1684_s4, 128 }
 0x519   : > { %p1230_p5 = scmp.ne.s32.totalorder %s1636_s11, %s1229_s2  ;;  %p1234_p3 = scmp.lt.u32.totalorder %s1636_s11, %s1684_s4 }
 0x51a   : > { %p1235_p9 = scmp.lt.u32.totalorder %s1233_s20, %s1229_s2  ;;  %p1237_p0 = scmp.lt.u32.totalorder %s1229_s2, %s1636_s11 }
 0x51b   : > { %p1231_p7 = pnand %p1230_p5, %p1721_p2 }
 0x51c   : > { %p1236_p11 = por %p1235_p9, %p1234_p3 }
 0x51d   : > { %p1232_p1 = pneg %p1231_p7 }
 0x51e   : > { %p1238_p12 = por %p1237_p0, %p1236_p11 }
 0x520   : > { %p1239_p10 = pnand %p1238_p12, %p1232_p1 }
 0x522   : > { %1242 = shalt.err (!%p1239_p10)
}
 0x523   : > { %1013 = dma.vmem_to_hbm [thread:$0]  (%p1721_p2), %s1638_s21, 64, %s1636_s11, %s770_s26  }
 0x524 PF: > { %s795_s1 = sand.u32 1, %s1277_s15   ;;  %p1722_p13 = scmp.ne.s32.totalorder %s1708_s5, 0 }
 0x525   : > { %p1723_p4 = scmp.ge.s32.totalorder %s1289_s18, 2  ;;  %s796_s24 = scalar_lea.sflag [#allocation4], %s795_s1 }
 0x527   : > { %p1030_p8 = pnand %p1723_p4, %p1722_p13 }
 0x529   : > { %1272 = dma.done.wait (!%p1030_p8), %s796_s24, 64  }
 0x52a   : > { %1274 = vsyncadd (!%p1030_p8), %s796_s24, 4294967232  ;;  %s1724_s18 = sld [smem:[#allocation15_spill]]  ;;  %s1725_s22 = sld [smem:[#allocation16_spill]] }
 0x52b   : > { %s1726_s15 = smov %s1281_s16  ;;  %s1727_s16 = smov %s1285_s17 }
 0x530   : > { %p21_p6 = scmp.ge.s32.totalorder %s1724_s18, 4   ;;  %s1728_s17 = smov %s1725_s22 }
 0x532   :  { %23 = sbr.rel (!%p21_p6) target bundleno = 11 (0xb), region = 110 }
 0x539   :  { %801 = vsyncpa [#allocation3], 1 }
 0x53a   :  { %803 = vsyncpa [#allocation3 + $0x1], 1 }
 0x53b   :  { %804 = vsyncpa [#allocation6], 1 }
 0x53c   :  { %806 = vsyncpa [#allocation6 + $0x1], 1 }
 0x53d   :  { %807 = vsyncpa [#allocation9], 1 }
 0x53e   :  { %809 = vsyncpa [#allocation9 + $0x1], 1 }
 0x53f   :  { %810 = vsyncpa [#allocation4], 1 }
 0x540   :  { %812 = vsyncpa [#allocation4 + $0x1], 1 }

// kernel: slopgpt_transformer_block.3
= control target key start
LH: loop header
LB: loop body
LE: loop exit
PB: predicated region body
PF: predicated region fallthrough
CT: control target
= control target key end

     0   :  { %12 = vsyncpa [#allocation3], 0  ;;  %s627_s0 = inlined_call_operand.hbm [shape: f32[16,32], index: 0, kind: input, shape index: {}]   ;;  %s628_s1 = inlined_call_operand.hbm [shape: f32[1,32], index: 1, kind: input, shape index: {}]   ;;  %s629_s2 = inlined_call_operand.hbm [shape: bf16[32,96], index: 2, kind: input, shape index: {}]   ;;  %s630_s3 = inlined_call_operand.hbm [shape: f32[1,96], index: 3, kind: input, shape index: {}]   ;;  %s631_s4 = inlined_call_operand.hbm [shape: bf16[16,32], index: 4, kind: output, shape index: {0}]   ;;  %s632_s5 = inlined_call_operand.hbm [shape: bf16[16,32], index: 5, kind: output, shape index: {1}]   ;;  %s633_s6 = inlined_call_operand.hbm [shape: bf16[16,32], index: 6, kind: output, shape index: {2}]  }
   0x1   :  { %13 = vsyncpa [#allocation6], 0 }
   0x2   :  { %14 = vsyncpa [#allocation9], 0 }
   0x3   :  { %15 = vsyncpa [#allocation4], 0 }
   0x4   :  { %16 = vsyncpa [#allocation12], 0  ;;  %s464_s21 = smov [#allocation5]   ;;  %s465_s23 = smov [#allocation2]  }
   0x5   :  { %s35_s22 = sshll.u32 %s464_s21, 4  ;;  %s22_s24 = sshll.u32 %s465_s23, 4  ;;  %s36_s22 = int_to_ptr.vmem [resolvable:$true] %s35_s22  ;;  %s513_s24 = int_to_ptr.vmem [resolvable:$true] %s22_s24 }
   0x6   :  { %s300_s27 = scalar_lea.hbm %s628_s1, 16 }
   0x7   :  { %p301_p0 = scmp.ne.s32.totalorder %s628_s1, %s300_s27  ;;  %p304_p1 = scmp.lt.u32.totalorder %s300_s27, %s628_s1 }
   0x9   :  { %p306_p2 = pnand %p304_p1, %p301_p0 }
   0xb   :  { %309 = shalt.err (!%p306_p2)
}
   0xc   :  { %s310_s8 = scalar_lea.vmem %s36_s22, 16  ;;  %s314_s9 = scalar_lea.vmem %s36_s22, 32 }
   0xd   :  { %p311_p3 = scmp.ne.s32.totalorder %s36_s22, %s310_s8  ;;  %p315_p4 = scmp.lt.s32.totalorder %s36_s22, %s36_s22 }
   0xe   :  { %p316_p5 = scmp.lt.s32.totalorder %s314_s9, %s310_s8 }
  0x10   :  { %p317_p6 = por %p316_p5, %p315_p4 }
  0x12   :  { %p318_p7 = pnand %p317_p6, %p311_p3 }
  0x14   :  { %321 = shalt.err (!%p318_p7)
}
  0x15   :  { %38 = dma.hbm_to_vmem [thread:$0]  %s628_s1, 16, %s36_s22, [#allocation6]  }
  0x16   :  { %s322_s14 = scalar_lea.hbm %s627_s0, 256 }
  0x17   :  { %p323_p8 = scmp.ne.s32.totalorder %s627_s0, %s322_s14  ;;  %p326_p9 = scmp.lt.u32.totalorder %s322_s14, %s627_s0 }
  0x19   :  { %p328_p10 = pnand %p326_p9, %p323_p8 }
  0x1b   :  { %331 = shalt.err (!%p328_p10)
}
  0x1c   :  { %s332_s19 = scalar_lea.vmem %s513_s24, 256  ;;  %p337_p12 = scmp.lt.s32.totalorder %s513_s24, %s513_s24 }
  0x1d   :  { %p333_p11 = scmp.ne.s32.totalorder %s513_s24, %s332_s19  ;;  %p338_p13 = scmp.lt.s32.totalorder %s332_s19, %s332_s19 }
  0x1f   :  { %p339_p0 = por %p338_p13, %p337_p12 }
  0x21   :  { %p340_p1 = pnand %p339_p0, %p333_p11 }
  0x23   :  { %343 = shalt.err (!%p340_p1)
}
  0x24   :  { %s466_s1 = smov 128   ;;  %s467_s20 = smov 8  }
  0x25   :  { %28 = dma.hbm_to_vmem [thread:$0]  %s627_s0, 256, %s513_s24, [#allocation3], %s466_s1, %s466_s1, %s467_s20  }
  0x26   :  { %s468_s23 = smov [#allocation7]   ;;  %s344_s28 = scalar_lea.hbm %s629_s2, 256 }
  0x27   :  { %s44_s25 = sshll.u32 %s468_s23, 4  ;;  %p345_p2 = scmp.ne.s32.totalorder %s629_s2, %s344_s28  ;;  %s45_s25 = int_to_ptr.vmem [resolvable:$true] %s44_s25 }
  0x28   :  { %p348_p3 = scmp.lt.u32.totalorder %s344_s28, %s629_s2 }
  0x2a   :  { %p350_p4 = pnand %p348_p3, %p345_p2 }
  0x2c   :  { %353 = shalt.err (!%p350_p4)
}
  0x2d   :  { %s354_s9 = scalar_lea.vmem %s45_s25, 256  ;;  %p359_p6 = scmp.lt.s32.totalorder %s45_s25, %s45_s25 }
  0x2e   :  { %p355_p5 = scmp.ne.s32.totalorder %s45_s25, %s354_s9  ;;  %p360_p7 = scmp.lt.s32.totalorder %s354_s9, %s354_s9 }
  0x30   :  { %p361_p8 = por %p360_p7, %p359_p6 }
  0x32   :  { %p362_p9 = pnand %p361_p8, %p355_p5 }
  0x34   :  { %365 = shalt.err (!%p362_p9)
}
  0x35   :  { %s469_s0 = smov 64   ;;  %s470_s24 = smov 4  }
  0x36   :  { %50 = dma.hbm_to_vmem [thread:$0]  %s629_s2, 256, %s45_s25, [#allocation6], %s469_s0, %s469_s0, %s470_s24  }
  0x37   :  { %s471_s12 = smov [#allocation8]   ;;  %s366_s16 = scalar_lea.hbm %s630_s3, 16 }
  0x38   :  { %s57_s13 = sshll.u32 %s471_s12, 4  ;;  %p367_p10 = scmp.ne.s32.totalorder %s630_s3, %s366_s16  ;;  %s58_s13 = int_to_ptr.vmem [resolvable:$true] %s57_s13 }
  0x39   :  { %p370_p11 = scmp.lt.u32.totalorder %s366_s16, %s630_s3 }
  0x3b   :  { %p372_p12 = pnand %p370_p11, %p367_p10 }
  0x3d   :  { %375 = shalt.err (!%p372_p12)
}
  0x3e   :  { %s376_s20 = scalar_lea.vmem %s58_s13, 16  ;;  %s380_s2 = scalar_lea.vmem %s58_s13, 32 }
  0x3f   :  { %p377_p13 = scmp.ne.s32.totalorder %s58_s13, %s376_s20  ;;  %p381_p0 = scmp.lt.s32.totalorder %s58_s13, %s58_s13 }
  0x40   :  { %p382_p1 = scmp.lt.s32.totalorder %s380_s2, %s376_s20 }
  0x42   :  { %p383_p2 = por %p382_p1, %p381_p0 }
  0x44   :  { %p384_p3 = pnand %p383_p2, %p377_p13 }
  0x46   :  { %387 = shalt.err (!%p384_p3)
}
  0x47   :  { %60 = dma.hbm_to_vmem [thread:$0]  %s630_s3, 16, %s58_s13, [#allocation9]  }
  0x48   :  { %454 = dma.done.wait [#allocation3], 256  }
  0x49   :  { %455 = vsyncadd [#allocation3], 4294967040 }
  0x4a   :  { %456 = dma.done.wait [#allocation6], 272  }
  0x4b   :  { %457 = vsyncadd [#allocation6], 4294967024 }
  0x4c   :  { %458 = dma.done.wait [#allocation9], 16  }
  0x4d   :  { %459 = vsyncadd [#allocation9], 4294967280  ;;  %v74_v0 = vld [vmem:[#allocation2] sm:$0xff]  ;;  %vm78_vm0 = vcmask 261120   ;;  %v75_v1 = vld [vmem:[#allocation2 + $0x8] sm:$0xff]  ;;  %v472_v7 = vmov 0.0  }
  0x4e   :  { %v76_v2 = vmul.f32 %v74_v0, %v74_v0  ;;  %v77_v3 = vmul.f32 %v75_v1, %v75_v1  ;;  %v294_v6 = vld [vmem:[#allocation7] sm:$0xff]   ;;  %272 = vmatprep.subr.bf16.mxu0 %v472_v7  ;;  %vm473_vm1 = vmmov 0   ;;  %v295_v8 = vld [vmem:[#allocation7 + $0x8] sm:$0xff]   ;;  %v256_v18 = vld [vmem:[#allocation5] ss:$0 sm:$0xff]  ;;  %vm181_vm2 = vcmask 257024  }
  0x4f   :  { %276 = vmatprep.mubr.msk.bf16.mxu0 %vm473_vm1, %v472_v7  ;;  %273 = vmatpush3.bf16.msra.mxu0 %v294_v6  ;;  %v257_v23 = vld [vmem:[#allocation8] ss:$0 sm:$0xff]  ;;  %s474_s3 = smov [#allocation10]   ;;  %s475_s25 = smov 96  }
  0x50   :  { %v79_v4 = vsel %vm78_vm0, %v76_v2, 0.0  ;;  %v82_v5 = vsel %vm78_vm0, %v77_v3, 0.0  ;;  %274 = vmatprep.subr.bf16.mxu0 %v472_v7  ;;  %s211_s23 = sshll.u32 %s474_s3, 4  ;;  %s212_s23 = int_to_ptr.vmem [resolvable:$true] %s211_s23 }
  0x51   :  { %80 = vadd.xlane.f32.xlu0 %v79_v4  ;;  %s388_s26 = scalar_lea.vmem %s212_s23, 128  ;;  %p393_p5 = scmp.lt.s32.totalorder %s212_s23, %s212_s23 }
  0x52   :  { %p389_p4 = scmp.ne.s32.totalorder %s212_s23, %s388_s26  ;;  %p394_p6 = scmp.lt.s32.totalorder %s388_s26, %s388_s26 }
  0x53   :  { %275 = vmatpush3.bf16.msra.mxu0 %v295_v8 }
  0x54   :  { %p395_p7 = por %p394_p6, %p393_p5 }
  0x55   :  { %83 = vadd.xlane.f32.xlu0 %v82_v5 }
  0x56   :  { %p396_p8 = pnand %p395_p7, %p389_p4 }
  0xde   :  { %v81_v9 = vpop.xlane.xlu0 %80 }
  0xdf   :  { %v86_v10 = vmul.f32 0.03125, %v81_v9 }
  0xe1   :  { %v88_v11 = vadd.f32 1e-06, %v86_v10 }
  0xe2   :  { %v84_v12 = vpop.xlane.xlu0 %83 }
  0xe3   :  { %296 = vrsqrt.f32 %v88_v11  ;;  %v87_v13 = vmul.f32 0.03125, %v84_v12 }
  0xe5   :  { %v89_v14 = vadd.f32 1e-06, %v87_v13 }
  0xe7   :  { %298 = vrsqrt.f32 %v89_v14 }
  0xed   :  { %v297_v15 = vpop.eup %296 }
  0xee   :  { %v92_v16 = vmul.f32 %v297_v15, %v74_v0 }
  0xf0   :  { %v101_v20 = vmul.f32 %v256_v18, %v92_v16 }
  0xf1   :  { %v299_v17 = vpop.eup %298 }
  0xf2   :  { %v93_v19 = vmul.f32 %v299_v17, %v75_v1 }
  0xf4   :  { %v102_v21 = vmul.f32 %v256_v18, %v93_v19 }
  0xf6   :  { %v103_v22 = vpack.c.bf16 %v102_v21, %v101_v20 }
  0xf8   :  { %277 = vmatmul.mubr.msk.bf16.vlgmr.msra.gmra.mrb[0].mxu0 %vm78_vm0, %v103_v22 }
 0x1cb   :  { %v164_v24 = vpop.f32.mrb[0].mxu0 }
 0x1cc   :  { %v165_v25 = vadd.f32 %v257_v23, %v164_v24  ;;  %v278_v26 = vpop.f32.mrb[1].mxu0 }
 0x1cd   :  { %v167_v27 = vpop.f32.mrb[2].mxu0 }
 0x1ce   :  { %v171_v28 = vmul.f32 0.35355338, %v165_v25  ;;  %v168_v29 = vadd.f32 %v257_v23, %v167_v27  ;;  %v279_v30 = vpop.f32.mrb[3].mxu0  ;;  %v267_v31 = vpack.c.bf16 %v165_v25, %v165_v25 }
 0x1d0   :  { %v265_v32 = vpack.c.bf16 %v171_v28, %v171_v28  ;;  %v172_v33 = vmul.f32 0.35355338, %v168_v29  ;;  %198 = vrot.lane.b32.xlu0 %v267_v31, %s469_s0  ;;  %190 = vrot.lane.b32.xlu1 %v267_v31, %s475_s25  ;;  %v268_v35 = vpack.c.bf16 %v168_v29, %v168_v29 }
 0x1d2   :  { %v266_v34 = vpack.c.bf16 %v172_v33, %v172_v33  ;;  %182 = vst.msk [vmem:[#allocation10] sm:$0xf] %vm181_vm2, %v265_v32 }
 0x1d4   :  { %192 = vrot.lane.b32.xlu1 %v268_v35, %s475_s25  ;;  %183 = vst.msk [vmem:[#allocation10 + $0x4] sm:$0xf] %vm181_vm2, %v266_v34 }
 0x1d5   :  { %399 = shalt.err (!%p396_p8)
}
 0x1d6   :  { %s400_s29 = scalar_lea.hbm %s631_s4, 128 }
 0x1d7   :  { %p401_p9 = scmp.ne.s32.totalorder %s631_s4, %s400_s29  ;;  %p404_p10 = scmp.lt.u32.totalorder %s400_s29, %s631_s4 }
 0x1d9   :  { %p406_p11 = pnand %p404_p10, %p401_p9 }
 0x1db   :  { %409 = shalt.err (!%p406_p11)
}
 0x1dc   :  { %217 = dma.vmem_to_hbm [thread:$0]  %s212_s23, 128, %s631_s4, [#allocation4], %s469_s0, %s469_s0, %s470_s24  }
 0x1dd   :  { %200 = vrot.lane.b32.xlu1 %v268_v35, %s469_s0  ;;  %s476_s12 = smov [#allocation11]   ;;  %s477_s14 = smov [#allocation13]  }
 0x1de   :  { %s223_s13 = sshll.u32 %s476_s12, 4  ;;  %s235_s15 = sshll.u32 %s477_s14, 4  ;;  %s224_s13 = int_to_ptr.vmem [resolvable:$true] %s223_s13  ;;  %s236_s15 = int_to_ptr.vmem [resolvable:$true] %s235_s15 }
 0x1df   :  { %s410_s16 = scalar_lea.vmem %s224_s13, 128  ;;  %p415_p13 = scmp.lt.s32.totalorder %s224_s13, %s224_s13 }
 0x1e0   :  { %p411_p12 = scmp.ne.s32.totalorder %s224_s13, %s410_s16  ;;  %p416_p0 = scmp.lt.s32.totalorder %s410_s16, %s410_s16 }
 0x1e2   :  { %p417_p1 = por %p416_p0, %p415_p13 }
 0x1e4   :  { %p418_p2 = pnand %p417_p1, %p411_p12 }
 0x242   :  { %v199_v36 = vpop.permute.xlu0 %198  ;;  %v191_v37 = vpop.permute.xlu1 %190 }
 0x243   :  { %204 = vst.msk [vmem:[#allocation13] sm:$0xf] %vm181_vm2, %v199_v36  ;;  %196 = vst.msk [vmem:[#allocation11] sm:$0xf] %vm181_vm2, %v191_v37 }
 0x246   :  { %v193_v38 = vpop.permute.xlu1 %192 }
 0x247   :  { %197 = vst.msk [vmem:[#allocation11 + $0x4] sm:$0xf] %vm181_vm2, %v193_v38 }
 0x248   :  { %421 = shalt.err (!%p418_p2)
}
 0x249   :  { %s422_s18 = scalar_lea.hbm %s632_s5, 128 }
 0x24a   :  { %p423_p3 = scmp.ne.s32.totalorder %s632_s5, %s422_s18  ;;  %p426_p4 = scmp.lt.u32.totalorder %s422_s18, %s632_s5 }
 0x24c   :  { %p428_p5 = pnand %p426_p4, %p423_p3 }
 0x24e   :  { %431 = shalt.err (!%p428_p5)
}
 0x24f   :  { %229 = dma.vmem_to_hbm [thread:$0]  %s224_s13, 128, %s632_s5, [#allocation12], %s469_s0, %s469_s0, %s470_s24   ;;  %v201_v39 = vpop.permute.xlu1 %200 }
 0x250   :  { %205 = vst.msk [vmem:[#allocation13 + $0x4] sm:$0xf] %vm181_vm2, %v201_v39  ;;  %s432_s3 = scalar_lea.vmem %s236_s15, 128  ;;  %p437_p7 = scmp.lt.s32.totalorder %s236_s15, %s236_s15 }
 0x251   :  { %p433_p6 = scmp.ne.s32.totalorder %s236_s15, %s432_s3  ;;  %p438_p8 = scmp.lt.s32.totalorder %s432_s3, %s432_s3 }
 0x253   :  { %p439_p9 = por %p438_p8, %p437_p7 }
 0x255   :  { %p440_p10 = pnand %p439_p9, %p433_p6 }
 0x257   :  { %443 = shalt.err (!%p440_p10)
}
 0x258   :  { %s444_s26 = scalar_lea.hbm %s633_s6, 128 }
 0x259   :  { %p445_p11 = scmp.ne.s32.totalorder %s633_s6, %s444_s26  ;;  %p448_p12 = scmp.lt.u32.totalorder %s444_s26, %s633_s6 }
 0x25b   :  { %p450_p13 = pnand %p448_p12, %p445_p11 }
 0x25d   :  { %453 = shalt.err (!%p450_p13)
}
 0x25e   :  { %241 = dma.vmem_to_hbm [thread:$0]  %s236_s15, 128, %s633_s6, [#allocation12], %s469_s0, %s469_s0, %s470_s24  }
 0x25f   :  { %460 = dma.done.wait [#allocation4], 128  }
 0x260   :  { %461 = vsyncadd [#allocation4], 4294967168 }
 0x261   :  { %462 = dma.done.wait [#allocation12], 256  }
 0x262   :  { %463 = vsyncadd [#allocation12], 4294967040 }
 0x263   :  { %251 = vsyncpa [#allocation3], 1 }
 0x264   :  { %252 = vsyncpa [#allocation6], 1 }
 0x265   :  { %253 = vsyncpa [#allocation9], 1 }
 0x266   :  { %254 = vsyncpa [#allocation4], 1 }
 0x267   :  { %255 = vsyncpa [#allocation12], 1 }

// kernel: slopgpt_transformer_block.5
= control target key start
LH: loop header
LB: loop body
LE: loop exit
PB: predicated region body
PF: predicated region fallthrough
CT: control target
= control target key end

     0   :  { %16 = vsyncpa [#allocation3], 0  ;;  %s1350_s0 = inlined_call_operand.hbm [shape: f32[16,32], index: 0, kind: input, shape index: {}]   ;;  %s1351_s1 = inlined_call_operand.hbm [shape: bf16[16,32], index: 1, kind: input, shape index: {}]   ;;  %s1352_s2 = inlined_call_operand.hbm [shape: bf16[32,32], index: 2, kind: input, shape index: {}]   ;;  %s1353_s3 = inlined_call_operand.hbm [shape: f32[1,32], index: 3, kind: input, shape index: {}]   ;;  %s1354_s4 = inlined_call_operand.hbm [shape: f32[1,32], index: 4, kind: input, shape index: {}]   ;;  %s1355_s5 = inlined_call_operand.hbm [shape: bf16[32,128], index: 5, kind: input, shape index: {}]   ;;  %s1356_s6 = inlined_call_operand.hbm [shape: f32[1,128], index: 6, kind: input, shape index: {}]   ;;  %s1357_s7 = inlined_call_operand.hbm [shape: bf16[128,128], index: 7, kind: input, shape index: {}]   ;;  %s1358_s8 = inlined_call_operand.hbm [shape: f32[1,128], index: 8, kind: input, shape index: {}]   ;;  %s1359_s9 = inlined_call_operand.hbm [shape: bf16[128,32], index: 9, kind: input, shape index: {}]   ;;  %s1360_s10 = inlined_call_operand.hbm [shape: f32[1,32], index: 10, kind: input, shape index: {}]   ;;  %s1361_s11 = inlined_call_operand.hbm [shape: f32[16,32], index: 11, kind: output, shape index: {}]  }
   0x1   :  { %17 = vsyncpa [#allocation6], 0 }
   0x2   :  { %18 = vsyncpa [#allocation9], 0 }
   0x3   :  { %19 = vsyncpa [#allocation12], 0 }
   0x4   :  { %20 = vsyncpa [#allocation15], 0 }
   0x5   :  { %21 = vsyncpa [#allocation18], 0 }
   0x6   :  { %22 = vsyncpa [#allocation4], 0  ;;  %s1061_s17 = smov [#allocation5]   ;;  %s783_s21 = scalar_lea.hbm %s1351_s1, 128 }
   0x7   :  { %s40_s18 = sshll.u32 %s1061_s17, 4  ;;  %p784_p0 = scmp.ne.s32.totalorder %s1351_s1, %s783_s21  ;;  %s41_s18 = int_to_ptr.vmem [resolvable:$true] %s40_s18 }
   0x8   :  { %p787_p1 = scmp.lt.u32.totalorder %s783_s21, %s1351_s1 }
   0xa   :  { %p789_p2 = pnand %p787_p1, %p784_p0 }
   0xc   :  { %792 = shalt.err (!%p789_p2)
}
   0xd   :  { %s793_s26 = scalar_lea.vmem %s41_s18, 128  ;;  %p798_p4 = scmp.lt.s32.totalorder %s41_s18, %s41_s18 }
   0xe   :  { %p794_p3 = scmp.ne.s32.totalorder %s41_s18, %s793_s26  ;;  %p799_p5 = scmp.lt.s32.totalorder %s793_s26, %s793_s26 }
  0x10   :  { %p800_p6 = por %p799_p5, %p798_p4 }
  0x12   :  { %p801_p7 = pnand %p800_p6, %p794_p3 }
  0x14   :  { %804 = shalt.err (!%p801_p7)
}
  0x15   :  { %s1062_s27 = smov 64   ;;  %s1063_s28 = smov 4  }
  0x16   :  { %46 = dma.hbm_to_vmem [thread:$0]  %s1351_s1, 128, %s41_s18, [#allocation6], %s1062_s27, %s1062_s27, %s1063_s28  }
  0x17   :  { %s1064_s12 = smov [#allocation8]   ;;  %s1065_s14 = smov [#allocation11]  }
  0x18   :  { %s65_s13 = sshll.u32 %s1064_s12, 4  ;;  %s84_s15 = sshll.u32 %s1065_s14, 4  ;;  %s66_s13 = int_to_ptr.vmem [resolvable:$true] %s65_s13  ;;  %s85_s15 = int_to_ptr.vmem [resolvable:$true] %s84_s15 }
  0x19   :  { %s805_s19 = scalar_lea.hbm %s1353_s3, 16 }
  0x1a   :  { %p806_p8 = scmp.ne.s32.totalorder %s1353_s3, %s805_s19  ;;  %p809_p9 = scmp.lt.u32.totalorder %s805_s19, %s1353_s3 }
  0x1c   :  { %p811_p10 = pnand %p809_p9, %p806_p8 }
  0x1e   :  { %814 = shalt.err (!%p811_p10)
}
  0x1f   :  { %s815_s1 = scalar_lea.vmem %s66_s13, 16  ;;  %s819_s18 = scalar_lea.vmem %s66_s13, 32 }
  0x20   :  { %p816_p11 = scmp.ne.s32.totalorder %s66_s13, %s815_s1  ;;  %p820_p12 = scmp.lt.s32.totalorder %s66_s13, %s66_s13 }
  0x21   :  { %p821_p13 = scmp.lt.s32.totalorder %s819_s18, %s815_s1 }
  0x23   :  { %p822_p0 = por %p821_p13, %p820_p12 }
  0x25   :  { %p823_p1 = pnand %p822_p0, %p816_p11 }
  0x27   :  { %826 = shalt.err (!%p823_p1)
}
  0x28   :  { %68 = dma.hbm_to_vmem [thread:$0]  %s1353_s3, 16, %s66_s13, [#allocation9]  }
  0x29   :  { %s827_s30 = scalar_lea.hbm %s1355_s5, 256 }
  0x2a   :  { %p828_p2 = scmp.ne.s32.totalorder %s1355_s5, %s827_s30  ;;  %p831_p3 = scmp.lt.u32.totalorder %s827_s30, %s1355_s5 }
  0x2c   :  { %p833_p4 = pnand %p831_p3, %p828_p2 }
  0x2e   :  { %836 = shalt.err (!%p833_p4)
}
  0x2f   :  { %s837_s19 = scalar_lea.vmem %s85_s15, 256  ;;  %p842_p6 = scmp.lt.s32.totalorder %s85_s15, %s85_s15 }
  0x30   :  { %p838_p5 = scmp.ne.s32.totalorder %s85_s15, %s837_s19  ;;  %p843_p7 = scmp.lt.s32.totalorder %s837_s19, %s837_s19 }
  0x32   :  { %p844_p8 = por %p843_p7, %p842_p6 }
  0x34   :  { %p845_p9 = pnand %p844_p8, %p838_p5 }
  0x36   :  { %848 = shalt.err (!%p845_p9)
}
  0x37   :  { %90 = dma.hbm_to_vmem [thread:$0]  %s1355_s5, 256, %s85_s15, [#allocation12], %s1062_s27, %s1062_s27, %s1063_s28  }
  0x38   :  { %s1066_s20 = smov [#allocation14]   ;;  %s1067_s22 = smov [#allocation17]  }
  0x39   :  { %s106_s21 = sshll.u32 %s1066_s20, 4  ;;  %s128_s23 = sshll.u32 %s1067_s22, 4  ;;  %s107_s21 = int_to_ptr.vmem [resolvable:$true] %s106_s21  ;;  %s129_s23 = int_to_ptr.vmem [resolvable:$true] %s128_s23 }
  0x3a   :  { %s849_s24 = scalar_lea.hbm %s1357_s7, 1024 }
  0x3b   :  { %p850_p10 = scmp.ne.s32.totalorder %s1357_s7, %s849_s24  ;;  %p853_p11 = scmp.lt.u32.totalorder %s849_s24, %s1357_s7 }
  0x3d   :  { %p855_p12 = pnand %p853_p11, %p850_p10 }
  0x3f   :  { %858 = shalt.err (!%p855_p12)
}
  0x40   :  { %s859_s5 = scalar_lea.vmem %s107_s21, 1024  ;;  %p864_p0 = scmp.lt.s32.totalorder %s107_s21, %s107_s21 }
  0x41   :  { %p860_p13 = scmp.ne.s32.totalorder %s107_s21, %s859_s5  ;;  %p865_p1 = scmp.lt.s32.totalorder %s859_s5, %s859_s5 }
  0x43   :  { %p866_p2 = por %p865_p1, %p864_p0 }
  0x45   :  { %p867_p3 = pnand %p866_p2, %p860_p13 }
  0x47   :  { %870 = shalt.err (!%p867_p3)
}
  0x48   :  { %112 = dma.hbm_to_vmem [thread:$0]  %s1357_s7, 1024, %s107_s21, [#allocation15], %s1062_s27, %s1062_s27, %s1063_s28  }
  0x49   :  { %s871_s17 = scalar_lea.hbm %s1359_s9, 1024 }
  0x4a   :  { %p872_p4 = scmp.ne.s32.totalorder %s1359_s9, %s871_s17  ;;  %p875_p5 = scmp.lt.u32.totalorder %s871_s17, %s1359_s9 }
  0x4c   :  { %p877_p6 = pnand %p875_p5, %p872_p4 }
  0x4e   :  { %880 = shalt.err (!%p877_p6)
}
  0x4f   :  { %s881_s22 = scalar_lea.vmem %s129_s23, 1024  ;;  %p886_p8 = scmp.lt.s32.totalorder %s129_s23, %s129_s23 }
  0x50   :  { %p882_p7 = scmp.ne.s32.totalorder %s129_s23, %s881_s22  ;;  %p887_p9 = scmp.lt.s32.totalorder %s881_s22, %s881_s22 }
  0x52   :  { %p888_p10 = por %p887_p9, %p886_p8 }
  0x54   :  { %p889_p11 = pnand %p888_p10, %p882_p7 }
  0x56   :  { %892 = shalt.err (!%p889_p11)
}
  0x57   :  { %134 = dma.hbm_to_vmem [thread:$0]  %s1359_s9, 1024, %s129_s23, [#allocation18], %s1062_s27, %s1062_s27, %s1063_s28  }
  0x58   :  { %s1068_s1 = smov [#allocation2]   ;;  %s893_s26 = scalar_lea.hbm %s1350_s0, 256 }
  0x59   :  { %s28_s18 = sshll.u32 %s1068_s1, 4  ;;  %p894_p12 = scmp.ne.s32.totalorder %s1350_s0, %s893_s26  ;;  %s29_s18 = int_to_ptr.vmem [resolvable:$true] %s28_s18 }
  0x5a   :  { %p897_p13 = scmp.lt.u32.totalorder %s893_s26, %s1350_s0 }
  0x5c   :  { %p899_p0 = pnand %p897_p13, %p894_p12 }
  0x5e   :  { %902 = shalt.err (!%p899_p0)
}
  0x5f   :  { %s903_s12 = scalar_lea.vmem %s29_s18, 256  ;;  %p908_p2 = scmp.lt.s32.totalorder %s29_s18, %s29_s18 }
  0x60   :  { %p904_p1 = scmp.ne.s32.totalorder %s29_s18, %s903_s12  ;;  %p909_p3 = scmp.lt.s32.totalorder %s903_s12, %s903_s12 }
  0x62   :  { %p910_p4 = por %p909_p3, %p908_p2 }
  0x64   :  { %p911_p5 = pnand %p910_p4, %p904_p1 }
  0x66   :  { %914 = shalt.err (!%p911_p5)
}
  0x67   :  { %s1069_s9 = smov 128   ;;  %s1070_s23 = smov 8  }
  0x68   :  { %34 = dma.hbm_to_vmem [thread:$0]  %s1350_s0, 256, %s29_s18, [#allocation3], %s1069_s9, %s1069_s9, %s1070_s23  }
  0x69   :  { %s1071_s17 = smov [#allocation7]   ;;  %s1072_s3 = smov [#allocation10]  }
  0x6a   :  { %s52_s19 = sshll.u32 %s1071_s17, 4  ;;  %s75_s13 = sshll.u32 %s1072_s3, 4  ;;  %s53_s19 = int_to_ptr.vmem [resolvable:$true] %s52_s19  ;;  %s76_s13 = int_to_ptr.vmem [resolvable:$true] %s75_s13 }
  0x6b   :  { %s915_s7 = scalar_lea.hbm %s1352_s2, 256 }
  0x6c   :  { %p916_p6 = scmp.ne.s32.totalorder %s1352_s2, %s915_s7  ;;  %p919_p7 = scmp.lt.u32.totalorder %s915_s7, %s1352_s2 }
  0x6e   :  { %p921_p8 = pnand %p919_p7, %p916_p6 }
  0x70   :  { %924 = shalt.err (!%p921_p8)
}
  0x71   :  { %s925_s0 = scalar_lea.vmem %s53_s19, 256  ;;  %p930_p10 = scmp.lt.s32.totalorder %s53_s19, %s53_s19 }
  0x72   :  { %p926_p9 = scmp.ne.s32.totalorder %s53_s19, %s925_s0  ;;  %p931_p11 = scmp.lt.s32.totalorder %s925_s0, %s925_s0 }
  0x74   :  { %p932_p12 = por %p931_p11, %p930_p10 }
  0x76   :  { %p933_p13 = pnand %p932_p12, %p926_p9 }
  0x78   :  { %936 = shalt.err (!%p933_p13)
}
  0x79   :  { %58 = dma.hbm_to_vmem [thread:$0]  %s1352_s2, 256, %s53_s19, [#allocation6], %s1062_s27, %s1062_s27, %s1063_s28  }
  0x7a   :  { %s937_s5 = scalar_lea.hbm %s1354_s4, 16 }
  0x7b   :  { %p938_p0 = scmp.ne.s32.totalorder %s1354_s4, %s937_s5  ;;  %p941_p1 = scmp.lt.u32.totalorder %s937_s5, %s1354_s4 }
  0x7d   :  { %p943_p2 = pnand %p941_p1, %p938_p0 }
  0x7f   :  { %946 = shalt.err (!%p943_p2)
}
  0x80   :  { %s947_s17 = scalar_lea.vmem %s76_s13, 16  ;;  %s951_s3 = scalar_lea.vmem %s76_s13, 32 }
  0x81   :  { %p948_p3 = scmp.ne.s32.totalorder %s76_s13, %s947_s17  ;;  %p952_p4 = scmp.lt.s32.totalorder %s76_s13, %s76_s13 }
  0x82   :  { %p953_p5 = scmp.lt.s32.totalorder %s951_s3, %s947_s17 }
  0x84   :  { %p954_p6 = por %p953_p5, %p952_p4 }
  0x86   :  { %p955_p7 = pnand %p954_p6, %p948_p3 }
  0x88   :  { %958 = shalt.err (!%p955_p7)
}
  0x89   :  { %78 = dma.hbm_to_vmem [thread:$0]  %s1354_s4, 16, %s76_s13, [#allocation9]  }
  0x8a   :  { %s1073_s28 = smov [#allocation13]   ;;  %s1074_s20 = smov [#allocation16]  }
  0x8b   :  { %s97_s19 = sshll.u32 %s1073_s28, 4  ;;  %s119_s22 = sshll.u32 %s1074_s20, 4  ;;  %s98_s19 = int_to_ptr.vmem [resolvable:$true] %s97_s19  ;;  %s120_s22 = int_to_ptr.vmem [resolvable:$true] %s119_s22 }
  0x8c   :  { %s959_s1 = scalar_lea.hbm %s1356_s6, 16 }
  0x8d   :  { %p960_p8 = scmp.ne.s32.totalorder %s1356_s6, %s959_s1  ;;  %p963_p9 = scmp.lt.u32.totalorder %s959_s1, %s1356_s6 }
  0x8f   :  { %p965_p10 = pnand %p963_p9, %p960_p8 }
  0x91   :  { %968 = shalt.err (!%p965_p10)
}
  0x92   :  { %s969_s4 = scalar_lea.vmem %s98_s19, 16  ;;  %s973_s13 = scalar_lea.vmem %s98_s19, 32 }
  0x93   :  { %p970_p11 = scmp.ne.s32.totalorder %s98_s19, %s969_s4  ;;  %p974_p12 = scmp.lt.s32.totalorder %s98_s19, %s98_s19 }
  0x94   :  { %p975_p13 = scmp.lt.s32.totalorder %s973_s13, %s969_s4 }
  0x96   :  { %p976_p0 = por %p975_p13, %p974_p12 }
  0x98   :  { %p977_p1 = pnand %p976_p0, %p970_p11 }
  0x9a   :  { %980 = shalt.err (!%p977_p1)
}
  0x9b   :  { %100 = dma.hbm_to_vmem [thread:$0]  %s1356_s6, 16, %s98_s19, [#allocation12]  }
  0x9c   :  { %s981_s15 = scalar_lea.hbm %s1358_s8, 16 }
  0x9d   :  { %p982_p2 = scmp.ne.s32.totalorder %s1358_s8, %s981_s15  ;;  %p985_p3 = scmp.lt.u32.totalorder %s981_s15, %s1358_s8 }
  0x9f   :  { %p987_p4 = pnand %p985_p3, %p982_p2 }
  0xa1   :  { %990 = shalt.err (!%p987_p4)
}
  0xa2   :  { %s991_s3 = scalar_lea.vmem %s120_s22, 16  ;;  %s995_s2 = scalar_lea.vmem %s120_s22, 32 }
  0xa3   :  { %p992_p5 = scmp.ne.s32.totalorder %s120_s22, %s991_s3  ;;  %p996_p6 = scmp.lt.s32.totalorder %s120_s22, %s120_s22 }
  0xa4   :  { %p997_p7 = scmp.lt.s32.totalorder %s995_s2, %s991_s3 }
  0xa6   :  { %p998_p8 = por %p997_p7, %p996_p6 }
  0xa8   :  { %p999_p9 = pnand %p998_p8, %p992_p5 }
  0xaa   :  { %1002 = shalt.err (!%p999_p9)
}
  0xab   :  { %122 = dma.hbm_to_vmem [thread:$0]  %s1358_s8, 16, %s120_s22, [#allocation15]  }
  0xac   :  { %s1075_s28 = smov [#allocation19]   ;;  %s1003_s21 = scalar_lea.hbm %s1360_s10, 16 }
  0xad   :  { %s141_s19 = sshll.u32 %s1075_s28, 4  ;;  %p1004_p10 = scmp.ne.s32.totalorder %s1360_s10, %s1003_s21  ;;  %s142_s19 = int_to_ptr.vmem [resolvable:$true] %s141_s19 }
  0xae   :  { %p1007_p11 = scmp.lt.u32.totalorder %s1003_s21, %s1360_s10 }
  0xb0   :  { %p1009_p12 = pnand %p1007_p11, %p1004_p10 }
  0xb2   :  { %1012 = shalt.err (!%p1009_p12)
}
  0xb3   :  { %s1013_s18 = scalar_lea.vmem %s142_s19, 16  ;;  %s1017_s8 = scalar_lea.vmem %s142_s19, 32 }
  0xb4   :  { %p1014_p13 = scmp.ne.s32.totalorder %s142_s19, %s1013_s18  ;;  %p1018_p0 = scmp.lt.s32.totalorder %s142_s19, %s142_s19 }
  0xb5   :  { %p1019_p1 = scmp.lt.s32.totalorder %s1017_s8, %s1013_s18 }
  0xb7   :  { %p1020_p2 = por %p1019_p1, %p1018_p0 }
  0xb9   :  { %p1021_p3 = pnand %p1020_p2, %p1014_p13 }
  0xbb   :  { %1024 = shalt.err (!%p1021_p3)
}
  0xbc   :  { %144 = dma.hbm_to_vmem [thread:$0]  %s1360_s10, 16, %s142_s19, [#allocation18]  }
  0xbd   :  { %1047 = dma.done.wait [#allocation3], 256  }
  0xbe   :  { %1048 = vsyncadd [#allocation3], 4294967040 }
  0xbf   :  { %1049 = dma.done.wait [#allocation6], 384  }
  0xc0   :  { %1050 = vsyncadd [#allocation6], 4294966912 }
  0xc1   :  { %1051 = dma.done.wait [#allocation9], 32  }
  0xc2   :  { %1052 = vsyncadd [#allocation9], 4294967264 }
  0xc3   :  { %1053 = dma.done.wait [#allocation12], 272  }
  0xc4   :  { %1054 = vsyncadd [#allocation12], 4294967024 }
  0xc5   :  { %1055 = dma.done.wait [#allocation15], 1040  }
  0xc6   :  { %1056 = vsyncadd [#allocation15], 4294966256 }
  0xc7   :  { %1057 = dma.done.wait [#allocation18], 1040  }
  0xc8   :  { %1058 = vsyncadd [#allocation18], 4294966256  ;;  %v1076_v0 = vmov 0.0   ;;  %vm1077_vm0 = vmmov 0   ;;  %v750_v1 = vld [vmem:[#allocation7] sm:$0xff]   ;;  %v751_v2 = vld [vmem:[#allocation7 + $0x8] sm:$0xff]  }
  0xc9   :  { %676 = vmatprep.subr.bf16.mxu0 %v1076_v0  ;;  %680 = vmatprep.mubr.msk.bf16.mxu0 %vm1077_vm0, %v1076_v0  ;;  %v752_v3 = vld [vmem:[#allocation5] sm:$0xff]   ;;  %vm204_vm1 = vcmask 261120   ;;  %v179_v4 = vld [vmem:[#allocation2] sm:$0xff]  ;;  %v626_v6 = vld [vmem:[#allocation8] ss:$0 sm:$0xff]  ;;  %s1078_s10 = smov [#allocation20]  }
  0xca   :  { %684 = vmatprep.subr.bf16.mxu1 %v1076_v0  ;;  %688 = vmatprep.mubr.msk.bf16.mxu1 %vm1077_vm0, %v1076_v0  ;;  %v180_v7 = vld [vmem:[#allocation2 + $0x8] sm:$0xff]  ;;  %v754_v20 = vld [vmem:[#allocation11 + $0x8] sm:$0xff]   ;;  %v755_v21 = vld [vmem:[#allocation14] sm:$0xff]   ;;  %s605_s13 = sshll.u32 %s1078_s10, 4  ;;  %s606_s13 = int_to_ptr.vmem [resolvable:$true] %s605_s13 }
  0xcb   :  { %677 = vmatpush3.bf16.msra.mxu0 %v750_v1  ;;  %v753_v19 = vld [vmem:[#allocation11] sm:$0xff]   ;;  %v758_v24 = vld [vmem:[#allocation14 + $0x18] sm:$0xff]   ;;  %v759_v25 = vld [vmem:[#allocation14 + $0x20] sm:$0xff]   ;;  %s1025_s26 = scalar_lea.vmem %s606_s13, 256  ;;  %p1030_p5 = scmp.lt.s32.totalorder %s606_s13, %s606_s13 }
  0xcc   :  { %678 = vmatprep.subr.bf16.mxu0 %v1076_v0  ;;  %685 = vmatpush3.bf16.msra.mxu1 %v753_v19  ;;  %v756_v22 = vld [vmem:[#allocation14 + $0x8] sm:$0xff]   ;;  %v757_v23 = vld [vmem:[#allocation14 + $0x10] sm:$0xff]   ;;  %v762_v42 = vld [vmem:[#allocation14 + $0x38] sm:$0xff]   ;;  %p1026_p4 = scmp.ne.s32.totalorder %s606_s13, %s1025_s26  ;;  %p1031_p6 = scmp.lt.s32.totalorder %s1025_s26, %s1025_s26 }
  0xcd   :  { %686 = vmatprep.subr.bf16.mxu1 %v1076_v0  ;;  %v760_v26 = vld [vmem:[#allocation14 + $0x28] sm:$0xff]   ;;  %v761_v41 = vld [vmem:[#allocation14 + $0x30] sm:$0xff]   ;;  %v628_v43 = vld [vmem:[#allocation13] ss:$0 sm:$0xff] }
  0xce   :  { %v627_v36 = vld [vmem:[#allocation10] ss:$0 sm:$0xff]  ;;  %v763_v51 = vld [vmem:[#allocation17] sm:$0xff]   ;;  %v765_v53 = vld [vmem:[#allocation17 + $0x10] sm:$0xff]   ;;  %p1032_p7 = por %p1031_p6, %p1030_p5 }
  0xcf   :  { %679 = vmatpush3.bf16.msra.mxu0 %v751_v2  ;;  %v764_v52 = vld [vmem:[#allocation17 + $0x8] sm:$0xff]   ;;  %v766_v54 = vld [vmem:[#allocation17 + $0x18] sm:$0xff]   ;;  %v767_v55 = vld [vmem:[#allocation17 + $0x20] sm:$0xff]  }
  0xd0   :  { %692 = vmatprep.subr.bf16.mxu0 %v1076_v0  ;;  %687 = vmatpush3.bf16.msra.mxu1 %v754_v20  ;;  %v768_v56 = vld [vmem:[#allocation17 + $0x28] sm:$0xff]   ;;  %v769_v57 = vld [vmem:[#allocation17 + $0x30] sm:$0xff]   ;;  %v770_v58 = vld [vmem:[#allocation17 + $0x38] sm:$0xff]   ;;  %p1033_p8 = pnand %p1032_p7, %p1026_p4 }
  0xd1   :  { %712 = vmatprep.subr.bf16.mxu1 %v1076_v0  ;;  %v632_v59 = vld [vmem:[#allocation16] ss:$0 sm:$0xff] }
  0xd2   :  { %681 = vmatmul.mubr.msk.bf16.vlgmr.msra.gmra.mrb[0].mxu0 %vm204_vm1, %v752_v3 }
  0xd3   :  { %708 = vmatprep.mubr.msk.bf16.mxu0 %vm1077_vm0, %v1076_v0  ;;  %693 = vmatpush3.bf16.msra.mxu0 %v755_v21 }
  0xd4   :  { %694 = vmatprep.subr.bf16.mxu0 %v1076_v0 }
  0xd7   :  { %695 = vmatpush3.bf16.msra.mxu0 %v756_v22 }
  0xd8   :  { %696 = vmatprep.subr.bf16.mxu0 %v1076_v0 }
  0xdb   :  { %697 = vmatpush3.bf16.msra.mxu0 %v757_v23 }
  0xdc   :  { %698 = vmatprep.subr.bf16.mxu0 %v1076_v0 }
  0xdf   :  { %699 = vmatpush3.bf16.msra.mxu0 %v758_v24 }
  0xe0   :  { %700 = vmatprep.subr.bf16.mxu0 %v1076_v0 }
  0xe3   :  { %701 = vmatpush3.bf16.msra.mxu0 %v759_v25 }
  0xe4   :  { %702 = vmatprep.subr.bf16.mxu0 %v1076_v0 }
  0xe7   :  { %703 = vmatpush3.bf16.msra.mxu0 %v760_v26 }
  0xe8   :  { %704 = vmatprep.subr.bf16.mxu0 %v1076_v0 }
  0xeb   :  { %705 = vmatpush3.bf16.msra.mxu0 %v761_v41 }
  0xec   :  { %706 = vmatprep.subr.bf16.mxu0 %v1076_v0 }
  0xef   :  { %707 = vmatpush3.bf16.msra.mxu0 %v762_v42 }
 0x1a5   :  { %v242_v5 = vpop.f32.mrb[0].mxu0 }
 0x1a6   :  { %v249_v8 = vadd.f32 %v242_v5, %v179_v4  ;;  %v682_v9 = vpop.f32.mrb[1].mxu0 }
 0x1a7   :  { %v245_v10 = vpop.f32.mrb[2].mxu0 }
 0x1a8   :  { %v1300_v11 = vadd.f32 %v626_v6, %v249_v8  ;;  %v250_v12 = vadd.f32 %v245_v10, %v180_v7  ;;  %v683_v13 = vpop.f32.mrb[3].mxu0 }
 0x1aa   :  { %v1302_v14 = vadd.f32 %v626_v6, %v250_v12  ;;  %v260_v15 = vmul.f32 %v1300_v11, %v1300_v11 }
 0x1ac   :  { %v262_v16 = vsel %vm204_vm1, %v260_v15, 0.0  ;;  %v261_v17 = vmul.f32 %v1302_v14, %v1302_v14 }
 0x1ad   :  { %263 = vadd.xlane.f32.xlu0 %v262_v16 }
 0x1ae   :  { %v265_v18 = vsel %vm204_vm1, %v261_v17, 0.0  ;;  %v643_v17 = vld [vmem:[#allocation19] ss:$0 sm:$0xff] }
 0x1b1   :  { %266 = vadd.xlane.f32.xlu0 %v265_v18 }
 0x23a   :  { %v264_v27 = vpop.xlane.xlu0 %263 }
 0x23b   :  { %v269_v28 = vmul.f32 0.03125, %v264_v27 }
 0x23d   :  { %v271_v29 = vadd.f32 1e-06, %v269_v28 }
 0x23e   :  { %v267_v30 = vpop.xlane.xlu0 %266 }
 0x23f   :  { %771 = vrsqrt.f32 %v271_v29  ;;  %v270_v31 = vmul.f32 0.03125, %v267_v30 }
 0x241   :  { %v272_v32 = vadd.f32 1e-06, %v270_v31 }
 0x243   :  { %773 = vrsqrt.f32 %v272_v32 }
 0x249   :  { %v772_v33 = vpop.eup %771 }
 0x24a   :  { %v275_v34 = vmul.f32 %v772_v33, %v1300_v11 }
 0x24c   :  { %v284_v38 = vmul.f32 %v627_v36, %v275_v34 }
 0x24d   :  { %v774_v35 = vpop.eup %773 }
 0x24e   :  { %v276_v37 = vmul.f32 %v774_v35, %v1302_v14 }
 0x250   :  { %v285_v39 = vmul.f32 %v627_v36, %v276_v37 }
 0x252   :  { %v286_v40 = vpack.c.bf16 %v285_v39, %v284_v38 }
 0x254   :  { %689 = vmatmul.mubr.msk.bf16.vlgmr.msra.gmra.mrb[0].mxu1 %vm204_vm1, %v286_v40 }
 0x255   :  { %728 = vmatprep.mubr.msk.bf16.mxu1 %vm1077_vm0, %v1076_v0  ;;  %713 = vmatpush3.bf16.msra.mxu1 %v763_v51 }
 0x256   :  { %714 = vmatprep.subr.bf16.mxu1 %v1076_v0 }
 0x259   :  { %715 = vmatpush3.bf16.msra.mxu1 %v764_v52 }
 0x25a   :  { %716 = vmatprep.subr.bf16.mxu1 %v1076_v0 }
 0x25d   :  { %717 = vmatpush3.bf16.msra.mxu1 %v765_v53 }
 0x25e   :  { %718 = vmatprep.subr.bf16.mxu1 %v1076_v0 }
 0x261   :  { %719 = vmatpush3.bf16.msra.mxu1 %v766_v54 }
 0x262   :  { %720 = vmatprep.subr.bf16.mxu1 %v1076_v0 }
 0x265   :  { %721 = vmatpush3.bf16.msra.mxu1 %v767_v55 }
 0x266   :  { %722 = vmatprep.subr.bf16.mxu1 %v1076_v0 }
 0x269   :  { %723 = vmatpush3.bf16.msra.mxu1 %v768_v56 }
 0x26a   :  { %724 = vmatprep.subr.bf16.mxu1 %v1076_v0 }
 0x26d   :  { %725 = vmatpush3.bf16.msra.mxu1 %v769_v57 }
 0x26e   :  { %726 = vmatprep.subr.bf16.mxu1 %v1076_v0 }
 0x271   :  { %727 = vmatpush3.bf16.msra.mxu1 %v770_v58 }
 0x327   :  { %v347_v44 = vpop.f32.mrb[0].mxu1 }
 0x328   :  { %v690_v45 = vpop.f32.mrb[1].mxu1  ;;  %v348_v47 = vadd.f32 %v628_v43, %v347_v44 }
 0x329   :  { %v350_v46 = vpop.f32.mrb[2].mxu1 }
 0x32a   :  { %v351_v48 = vadd.f32 %v628_v43, %v350_v46  ;;  %v691_v49 = vpop.f32.mrb[3].mxu1 }
 0x32c   :  { %v354_v50 = vpack.c.bf16 %v351_v48, %v348_v47 }
 0x32e   :  { %709 = vmatmul.mubr.bf16.vlgmr.msra.gmra.mrb[4].mxu0 %v354_v50 }
 0x401   :  { %v460_v60 = vpop.f32.mrb[4].mxu0 }
 0x402   :  { %v461_v61 = vadd.f32 %v632_v59, %v460_v60  ;;  %v710_v62 = vpop.f32.mrb[5].mxu0 }
 0x403   :  { %v463_v63 = vpop.f32.mrb[6].mxu0 }
 0x404   :  { %v641_v1 = vmul.f32 -1.442695, %v461_v61  ;;  %v464_v2 = vadd.f32 %v632_v59, %v463_v63  ;;  %v711_v3 = vpop.f32.mrb[7].mxu0 }
 0x406   :  { %775 = vpow2.f32 %v641_v1  ;;  %v642_v4 = vmul.f32 -1.442695, %v464_v2 }
 0x408   :  { %777 = vpow2.f32 %v642_v4 }
 0x410   :  { %v776_v5 = vpop.eup %775 }
 0x411   :  { %v473_v6 = vadd.f32 1.0, %v776_v5 }
 0x412   :  { %v778_v7 = vpop.eup %777 }
 0x413   :  { %779 = vrcp.f32 %v473_v6  ;;  %v474_v8 = vadd.f32 1.0, %v778_v7 }
 0x415   :  { %781 = vrcp.f32 %v474_v8 }
 0x41d   :  { %v780_v0 = vpop.eup %779 }
 0x41e   :  { %v479_v9 = vmul.f32 %v780_v0, %v461_v61 }
 0x41f   :  { %v782_v10 = vpop.eup %781 }
 0x420   :  { %v480_v12 = vmul.f32 %v782_v10, %v464_v2  ;;  %v481_v13 = vmul.f32 %v479_v9, %v348_v47 }
 0x422   :  { %v482_v15 = vmul.f32 %v480_v12, %v351_v48 }
 0x424   :  { %v483_v16 = vpack.c.bf16 %v482_v15, %v481_v13 }
 0x426   :  { %729 = vmatmul.mubr.bf16.vlgmr.msra.gmra.mrb[4].mxu1 %v483_v16 }
 0x4f9   :  { %v589_v18 = vpop.f32.mrb[4].mxu1 }
 0x4fa   :  { %v590_v19 = vadd.f32 %v643_v17, %v589_v18  ;;  %v730_v20 = vpop.f32.mrb[5].mxu1 }
 0x4fb   :  { %v592_v21 = vpop.f32.mrb[6].mxu1 }
 0x4fc   :  { %v596_v22 = vadd.f32 %v590_v19, %v1300_v11  ;;  %v593_v23 = vadd.f32 %v643_v17, %v592_v21  ;;  %v731_v24 = vpop.f32.mrb[7].mxu1 }
 0x4fe   :  { %598 = vst.msk [vmem:[#allocation20] sm:$0xff] %vm204_vm1, %v596_v22  ;;  %v597_v25 = vadd.f32 %v593_v23, %v1302_v14 }
 0x500   :  { %599 = vst.msk [vmem:[#allocation20 + $0x8] sm:$0xff] %vm204_vm1, %v597_v25 }
 0x501   :  { %1036 = shalt.err (!%p1033_p8)
}
 0x502   :  { %s1037_s5 = scalar_lea.hbm %s1361_s11, 256 }
 0x503   :  { %p1038_p9 = scmp.ne.s32.totalorder %s1361_s11, %s1037_s5  ;;  %p1041_p10 = scmp.lt.u32.totalorder %s1037_s5, %s1361_s11 }
 0x505   :  { %p1043_p11 = pnand %p1041_p10, %p1038_p9 }
 0x507   :  { %1046 = shalt.err (!%p1043_p11)
}
 0x508   :  { %611 = dma.vmem_to_hbm [thread:$0]  %s606_s13, 256, %s1361_s11, [#allocation4], %s1069_s9, %s1069_s9, %s1070_s23  }
 0x509   :  { %1059 = dma.done.wait [#allocation4], 256  }
 0x50a   :  { %1060 = vsyncadd [#allocation4], 4294967040 }
 0x50b   :  { %615 = vsyncpa [#allocation3], 1 }
 0x50c   :  { %616 = vsyncpa [#allocation6], 1 }
 0x50d   :  { %617 = vsyncpa [#allocation9], 1 }
 0x50e   :  { %618 = vsyncpa [#allocation12], 1 }
 0x50f   :  { %619 = vsyncpa [#allocation15], 1 }
 0x510   :  { %620 = vsyncpa [#allocation18], 1 }
 0x511   :  { %621 = vsyncpa [#allocation4], 1 }

</bundles_post_ra>
